<compile_context>
chip_gen: v6e
topology: v6e:2x2x1
jax: 0.10.0
libtpu: 0.0.40
codegen_flags: <defaults>
</compile_context>

<pallas_src>
import math
import functools

import jax
import jax.numpy as jnp
from jax.experimental import pallas as pl
from jax.experimental.pallas import tpu as pltpu


MATMUL_DTYPE = jnp.bfloat16   # jnp.float32 for exact-precision validation
LN_EPS = 1e-5


# ---------------------------------------------------------------------------
# In-kernel helpers (traced inside the Pallas kernels)
# ---------------------------------------------------------------------------
def _layer_norm(y, w, b):
    mu = jnp.mean(y, axis=-1, keepdims=True)
    var = jnp.mean(jnp.square(y - mu), axis=-1, keepdims=True)
    return (y - mu) * jax.lax.rsqrt(var + LN_EPS) * w + b


def _attend(q_all, k_all, v_all, wo, bo, attn_ref, nhead, mm_dtype):
    """Multi-head attention for one batch element.

    q_all/k_all/v_all: (S, D) f32, already projected (q pre-scaled by 1/sqrt(hd)).
    wo: (D, D) pre-transposed out-projection; bo: (1, D).
    Heads are split only for the score / weighted-sum matmuls; head outputs are
    written heads-last into `attn_ref` so the output projection is ONE (S,D)@(D,D).
    """
    S, D = q_all.shape
    hd = D // nhead
    nt_dims = (((1,), (1,)), ((), ()))            # contract last dims: q @ k^T
    for h in range(nhead):
        sl = slice(h * hd, (h + 1) * hd)
        qh = q_all[:, sl].astype(mm_dtype)
        kh = k_all[:, sl].astype(mm_dtype)
        vh = v_all[:, sl].astype(mm_dtype)
        s = jax.lax.dot_general(qh, kh, nt_dims,
                                preferred_element_type=jnp.float32)     # (S, S)
        s = s - jnp.max(s, axis=-1, keepdims=True)
        p = jnp.exp(s)
        p = p * pl.reciprocal(jnp.sum(p, axis=-1, keepdims=True), approx=True)
        attn_ref[:, sl] = jnp.dot(p.astype(mm_dtype), vh,
                                  preferred_element_type=jnp.float32)   # (S, hd)
    o = attn_ref[...].astype(mm_dtype)                                  # (S, D)
    return jnp.dot(o, wo, preferred_element_type=jnp.float32) + bo


# ---------------------------------------------------------------------------
# Kernel 1: the full decoder stack, grid = (batch, layer)
# ---------------------------------------------------------------------------
def decoder_stack_kernel(x0_ref,
                         w_qkv_ref, b_qkv_ref, w_sao_ref, b_sao_ref,
                         w_caq_ref, b_caq_ref, w_cakv_ref, b_cakv_ref,
                         w_cao_ref, b_cao_ref,
                         w_ff1_ref, b_ff1_ref, w_ff2_ref, b_ff2_ref,
                         ln1w_ref, ln1b_ref, ln2w_ref, ln2b_ref,
                         ln3w_ref, ln3b_ref,
                         out_ref,
                         x_ref, attn_ref,
                         *, nhead, mm_dtype):
    l = pl.program_id(1)
    nl = pl.num_programs(1)
    D = x0_ref.shape[-1]

    @pl.when(l == 0)
    def _init():                      # new batch element: reset the carried activation
        x_ref[...] = x0_ref[...]

    x = x_ref[...]                    # (S, D) f32
    mem = x0_ref[...]                 # memory == pos-encoded src (constant per batch)

    # ---- self-attention: one packed (S,D)@(D,3D) projection ----
    qkv = jnp.dot(x.astype(mm_dtype), w_qkv_ref[...],
                  preferred_element_type=jnp.float32) + b_qkv_ref[...]      # (S, 3D)
    sa = _attend(qkv[:, 0:D], qkv[:, D:2 * D], qkv[:, 2 * D:3 * D],
                 w_sao_ref[...], b_sao_ref[...], attn_ref, nhead, mm_dtype)
    x = _layer_norm(x + sa, ln1w_ref[...], ln1b_ref[...])

    # ---- cross-attention against memory: packed (S,D)@(D,2D) KV projection ----
    q = jnp.dot(x.astype(mm_dtype), w_caq_ref[...],
                preferred_element_type=jnp.float32) + b_caq_ref[...]        # (S, D)
    kv = jnp.dot(mem.astype(mm_dtype), w_cakv_ref[...],
                 preferred_element_type=jnp.float32) + b_cakv_ref[...]      # (S, 2D)
    ca = _attend(q, kv[:, 0:D], kv[:, D:2 * D],
                 w_cao_ref[...], b_cao_ref[...], attn_ref, nhead, mm_dtype)
    x = _layer_norm(x + ca, ln2w_ref[...], ln2b_ref[...])

    # ---- feed-forward: linear1 -> ReLU -> linear2 (weights pre-transposed) ----
    h = jnp.maximum(jnp.dot(x.astype(mm_dtype), w_ff1_ref[...],
                            preferred_element_type=jnp.float32) + b_ff1_ref[...], 0.0)
    ff = jnp.dot(h.astype(mm_dtype), w_ff2_ref[...],
                 preferred_element_type=jnp.float32) + b_ff2_ref[...]
    x = _layer_norm(x + ff, ln3w_ref[...], ln3b_ref[...])

    x_ref[...] = x                    # carry to next layer iteration

    @pl.when(l == nl - 1)
    def _final():
        out_ref[...] = x


# ---------------------------------------------------------------------------
# Kernel 2: final Linear, tiled over the (padded) vocab dimension
# ---------------------------------------------------------------------------
def vocab_proj_kernel(x_ref, w_ref, b_ref, out_ref, *, mm_dtype):
    out_ref[...] = (jnp.dot(x_ref[...].astype(mm_dtype), w_ref[...],
                            preferred_element_type=jnp.float32) + b_ref[...])


# ---------------------------------------------------------------------------
# Host-side weight preparation (pre-transpose, pack, fold scales, layer-stack)
# ---------------------------------------------------------------------------
def prepare_weights(params, nhead, d_model, mm_dtype):
    D = d_model
    hd = D // nhead
    qscale = 1.0 / math.sqrt(hd)      # attention scale folded into Q weights/bias

    w_qkv, b_qkv, w_sao, b_sao = [], [], [], []
    w_caq, b_caq, w_cakv, b_cakv, w_cao, b_cao = [], [], [], [], [], []
    w_ff1, b_ff1, w_ff2, b_ff2 = [], [], [], []
    ln = {k: [] for k in ("ln1_w", "ln1_b", "ln2_w", "ln2_b", "ln3_w", "ln3_b")}

    for lp in params["layers"]:
        wq, wk, wv = (lp["sa_in_w"][i * D:(i + 1) * D] for i in range(3))
        bq, bk, bv = (lp["sa_in_b"][i * D:(i + 1) * D] for i in range(3))
        w_qkv.append(jnp.concatenate([wq.T * qscale, wk.T, wv.T], axis=1))   # (D, 3D)
        b_qkv.append(jnp.concatenate([bq * qscale, bk, bv])[None, :])        # (1, 3D)
        w_sao.append(lp["sa_out_w"].T)                                       # (D, D)
        b_sao.append(lp["sa_out_b"][None, :])

        cwq, cwk, cwv = (lp["ca_in_w"][i * D:(i + 1) * D] for i in range(3))
        cbq, cbk, cbv = (lp["ca_in_b"][i * D:(i + 1) * D] for i in range(3))
        w_caq.append(cwq.T * qscale)                                         # (D, D)
        b_caq.append((cbq * qscale)[None, :])
        w_cakv.append(jnp.concatenate([cwk.T, cwv.T], axis=1))               # (D, 2D)
        b_cakv.append(jnp.concatenate([cbk, cbv])[None, :])
        w_cao.append(lp["ca_out_w"].T)
        b_cao.append(lp["ca_out_b"][None, :])

        w_ff1.append(lp["l1_w"].T)                                           # (D, Dh)
        b_ff1.append(lp["l1_b"][None, :])
        w_ff2.append(lp["l2_w"].T)                                           # (Dh, D)
        b_ff2.append(lp["l2_b"][None, :])
        for k in ln:
            ln[k].append(lp[k][None, :])

    def stack_w(xs):   # matmul operands in mm_dtype (halves HBM traffic / VMEM)
        return jnp.stack(xs, 0).astype(mm_dtype)

    def stack_f(xs):   # biases / LN params stay f32 (applied after f32 accumulation)
        return jnp.stack(xs, 0).astype(jnp.float32)

    layer_weights = (
        stack_w(w_qkv), stack_f(b_qkv), stack_w(w_sao), stack_f(b_sao),
        stack_w(w_caq), stack_f(b_caq), stack_w(w_cakv), stack_f(b_cakv),
        stack_w(w_cao), stack_f(b_cao),
        stack_w(w_ff1), stack_f(b_ff1), stack_w(w_ff2), stack_f(b_ff2),
        stack_f(ln["ln1_w"]), stack_f(ln["ln1_b"]),
        stack_f(ln["ln2_w"]), stack_f(ln["ln2_b"]),
        stack_f(ln["ln3_w"]), stack_f(ln["ln3_b"]),
    )

    # final decoder Linear: pre-transposed, vocab padded to lane-dense multiple of 128
    V = params["dec_w"].shape[0]
    v_pad = ((V + 127) // 128) * 128
    dec_w = jnp.zeros((D, v_pad), jnp.float32).at[:, :V].set(
        params["dec_w"].T).astype(mm_dtype)
    dec_b = jnp.zeros((1, v_pad), jnp.float32).at[:, :V].set(
        params["dec_b"][None, :])
    return layer_weights, dec_w, dec_b, v_pad


# ---------------------------------------------------------------------------
# Positional encoding, parameter construction (PyTorch layout), forward
# ---------------------------------------------------------------------------
def positional_encoding(max_len, d_model):
    position = jnp.arange(max_len, dtype=jnp.float32)[:, None]
    div_term = jnp.exp(jnp.arange(0, d_model, 2, dtype=jnp.float32)
                       * (-math.log(10000.0) / d_model))
    pe = jnp.zeros((max_len, d_model), jnp.float32)
    pe = pe.at[:, 0::2].set(jnp.sin(position * div_term))
    pe = pe.at[:, 1::2].set(jnp.cos(position * div_term))
    return pe  # (max_len, d_model)


def init_params(key, ntoken, d_model, nhead, d_hid, nlayers):
    keys = jax.random.split(key, 2 + nlayers)
    initrange = 0.1
    params = {
        "emb": jax.random.uniform(keys[0], (ntoken, d_model), jnp.float32,
                                  -initrange, initrange),
        "dec_w": jax.random.uniform(keys[1], (ntoken, d_model), jnp.float32,
                                    -initrange, initrange),
        "dec_b": jnp.zeros((ntoken,), jnp.float32),
    }

    def u(kk, shape, bound):
        return jax.random.uniform(kk, shape, jnp.float32, -bound, bound)

    bd = 1.0 / math.sqrt(d_model)
    bh = 1.0 / math.sqrt(d_hid)
    layers = []
    for l in range(nlayers):
        k = jax.random.split(keys[2 + l], 8)
        layers.append(dict(
            sa_in_w=u(k[0], (3 * d_model, d_model), bd),
            sa_in_b=jnp.zeros((3 * d_model,), jnp.float32),
            sa_out_w=u(k[1], (d_model, d_model), bd),
            sa_out_b=jnp.zeros((d_model,), jnp.float32),
            ca_in_w=u(k[2], (3 * d_model, d_model), bd),
            ca_in_b=jnp.zeros((3 * d_model,), jnp.float32),
            ca_out_w=u(k[3], (d_model, d_model), bd),
            ca_out_b=jnp.zeros((d_model,), jnp.float32),
            l1_w=u(k[4], (d_hid, d_model), bd),
            l1_b=u(k[5], (d_hid,), bd),
            l2_w=u(k[6], (d_model, d_hid), bh),
            l2_b=u(k[7], (d_model,), bh),
            ln1_w=jnp.ones((d_model,), jnp.float32),
            ln1_b=jnp.zeros((d_model,), jnp.float32),
            ln2_w=jnp.ones((d_model,), jnp.float32),
            ln2_b=jnp.zeros((d_model,), jnp.float32),
            ln3_w=jnp.ones((d_model,), jnp.float32),
            ln3_b=jnp.zeros((d_model,), jnp.float32),
        ))
    params["layers"] = layers
    return params


def simple_transformer_forward(params, src, nhead, d_model, mm_dtype=MATMUL_DTYPE):
    """src: (S, B) int32 token ids. Returns (S, B, ntoken) float32 logits."""
    S, B = src.shape
    N = B * S
    D = d_model
    H = nhead
    hd = D // H
    V = params["dec_w"].shape[0]
    L = len(params["layers"])
    Dh = params["layers"][0]["l1_w"].shape[0]

    # plain-JAX glue: data-dependent embedding gather + positional encoding.
    # sqrt(d_model) scale is folded into the table (review: free VPU savings).
    emb = jnp.take(params["emb"] * math.sqrt(D), src, axis=0)          # (S, B, D)
    x0 = emb + positional_encoding(S, D)[:, None, :]                   # (S, B, D)
    x0 = jnp.transpose(x0, (1, 0, 2)).astype(jnp.float32)              # (B, S, D)

    layer_weights, dec_w, dec_b, v_pad = prepare_weights(params, nhead, D, mm_dtype)

    # ---- kernel 1: decoder stack, grid = (batch [parallel], layer [arbitrary]) ----
    lw_specs = [pl.BlockSpec((None,) + w.shape[1:], lambda b, l: (l, 0, 0))
                for w in layer_weights]
    in_specs = [pl.BlockSpec((None, S, D), lambda b, l: (b, 0, 0))] + lw_specs

    flops_layer = (2 * S * D * 3 * D + 2 * S * D * D          # self-attn qkv + out
                   + 2 * S * D * D + 2 * S * D * 2 * D        # cross-attn q + kv
                   + 2 * S * D * D                            # cross-attn out
                   + 2 * (2 * H * S * S * hd) * 2             # scores + p@v, both attns
                   + 2 * S * D * Dh * 2)                      # feed-forward
    weight_bytes = sum(int(w.size) * w.dtype.itemsize for w in layer_weights)
    cost_stack = pl.CostEstimate(
        flops=int(B * L * flops_layer),
        transcendentals=int(B * L * 2 * H * S * S),
        bytes_accessed=int(B * weight_bytes + 2 * N * D * 4))

    hidden = pl.pallas_call(
        functools.partial(decoder_stack_kernel, nhead=nhead, mm_dtype=mm_dtype),
        out_shape=jax.ShapeDtypeStruct((B, S, D), jnp.float32),
        grid=(B, L),
        in_specs=in_specs,
        out_specs=pl.BlockSpec((None, S, D), lambda b, l: (b, 0, 0)),
        scratch_shapes=[pltpu.VMEM((S, D), jnp.float32),    # carried activation x
                        pltpu.VMEM((S, D), jnp.float32)],   # heads-last attention out
        compiler_params=pltpu.CompilerParams(
            dimension_semantics=("parallel", "arbitrary"),
            vmem_limit_bytes=64 * 1024 * 1024),
        cost_estimate=cost_stack,
    )(x0, *layer_weights)

    # ---- kernel 2: final Linear, parallel-tiled over the padded vocab ----
    x2d = hidden.reshape(N, D)
    TV = 128
    cost_proj = pl.CostEstimate(
        flops=int(2 * N * D * v_pad), transcendentals=0,
        bytes_accessed=int(N * D * 4 + int(dec_w.size) * dec_w.dtype.itemsize
                           + v_pad * 4 + N * v_pad * 4))
    logits_pad = pl.pallas_call(
        functools.partial(vocab_proj_kernel, mm_dtype=mm_dtype),
        out_shape=jax.ShapeDtypeStruct((N, v_pad), jnp.float32),
        grid=(v_pad // TV,),
        in_specs=[pl.BlockSpec((N, D), lambda j: (0, 0)),
                  pl.BlockSpec((D, TV), lambda j: (0, j)),
                  pl.BlockSpec((1, TV), lambda j: (0, j))],
        out_specs=pl.BlockSpec((N, TV), lambda j: (0, j)),
        compiler_params=pltpu.CompilerParams(
            dimension_semantics=("parallel",),
            vmem_limit_bytes=64 * 1024 * 1024),
        cost_estimate=cost_proj,
    )(x2d, dec_w, dec_b)

    logits = logits_pad[:, :V]                                 # drop vocab padding
    return logits.reshape(B, S, V).transpose(1, 0, 2)          # (S, B, ntoken)


if __name__ == "__main__":
    ntoken, d_model, nhead, d_hid, nlayers = 50, 32, 4, 64, 2
    S, B = 8, 2

    key = jax.random.PRNGKey(0)
    pkey, dkey = jax.random.split(key)
    params = init_params(pkey, ntoken, d_model, nhead, d_hid, nlayers)
    src = jax.random.randint(dkey, (S, B), 0, ntoken, dtype=jnp.int32)

    fwd = jax.jit(functools.partial(simple_transformer_forward,
                                    nhead=nhead, d_model=d_model))
    out = jax.block_until_ready(fwd(params, src))
    assert out.shape == (S, B, ntoken), out.shape
    assert bool(jnp.all(jnp.isfinite(out)))
    print("KERNEL_OK")
</pallas_src>

<mosaic_0001>
module attributes {stable_mosaic.version = 11 : i64} {
  func.func @vocab_proj_kernel(%arg0: i32, %arg1: memref<16x32xf32, #tpu.memory_space<vmem>>, %arg2: memref<32x128xbf16, #tpu.memory_space<vmem>>, %arg3: memref<1x128xf32, #tpu.memory_space<vmem>>, %arg4: memref<16x128xf32, #tpu.memory_space<vmem>>) attributes {dimension_semantics = [#tpu.dimension_semantics<parallel>], iteration_bounds = array<i64: 1>, scalar_prefetch = 0 : i64, scratch_operands = 0 : i64, tpu.core_type = #tpu.core_type<tc>, window_params = [{pipeline_mode = #tpu.pipeline_mode<synchronous>, transform_indices = @transform_0, window_bounds = array<i64: 16, 32>}, {transform_indices = @transform_1, window_bounds = array<i64: 32, 128>}, {transform_indices = @transform_2, window_bounds = array<i64: 1, 128>}, {transform_indices = @transform_3, window_bounds = array<i64: 16, 128>}]} {
    %c0 = arith.constant 0 : index
    %c0_0 = arith.constant 0 : index
    %0 = vector.load %arg1[%c0, %c0_0] : memref<16x32xf32, #tpu.memory_space<vmem>>, vector<16x32xf32>
    %1 = arith.truncf %0 : vector<16x32xf32> to vector<16x32xbf16>
    %c0_1 = arith.constant 0 : index
    %c0_2 = arith.constant 0 : index
    %2 = vector.load %arg2[%c0_1, %c0_2] : memref<32x128xbf16, #tpu.memory_space<vmem>>, vector<32x128xbf16>
    %cst = arith.constant dense<0.000000e+00> : vector<16x128xf32>
    %3 = tpu.matmul %1, %2, %cst {dimension_numbers = #tpu.dot_dimension_numbers<[1], [0], [0], [1], [0, 0, 1, 1], [], []>} : vector<16x32xbf16>, vector<32x128xbf16>, vector<16x128xf32> -> vector<16x128xf32>
    %c0_3 = arith.constant 0 : index
    %c0_4 = arith.constant 0 : index
    %4 = vector.load %arg3[%c0_3, %c0_4] : memref<1x128xf32, #tpu.memory_space<vmem>>, vector<1x128xf32>
    %5 = vector.broadcast %4 : vector<1x128xf32> to vector<16x128xf32>
    %6 = arith.addf %3, %5 : vector<16x128xf32>
    %c0_5 = arith.constant 0 : index
    %c0_6 = arith.constant 0 : index
    %7 = vector.load %arg4[%c0_5, %c0_6] : memref<16x128xf32, #tpu.memory_space<vmem>>, vector<16x128xf32>
    tpu.vector_store %arg4[%c0_5, %c0_6], %6 {strides = array<i32>} : memref<16x128xf32, #tpu.memory_space<vmem>>, vector<16x128xf32>,
    return
  }
  func.func @transform_0(%arg0: i32) -> (i32, i32) {
    %c0_i32 = arith.constant 0 : i32
    %c0_i32_0 = arith.constant 0 : i32
    %c0_i32_1 = arith.constant 0 : i32
    return %c0_i32, %c0_i32_0 : i32, i32
  }
  func.func @transform_1(%arg0: i32) -> (i32, i32) {
    %c0_i32 = arith.constant 0 : i32
    %c0_i32_0 = arith.constant 0 : i32
    return %c0_i32, %arg0 : i32, i32
  }
  func.func @transform_2(%arg0: i32) -> (i32, i32) {
    %c0_i32 = arith.constant 0 : i32
    %c0_i32_0 = arith.constant 0 : i32
    return %c0_i32, %arg0 : i32, i32
  }
  func.func @transform_3(%arg0: i32) -> (i32, i32) {
    %c0_i32 = arith.constant 0 : i32
    %c0_i32_0 = arith.constant 0 : i32
    return %c0_i32, %arg0 : i32, i32
  }
}

module attributes {stable_mosaic.version = 11 : i64} {
  func.func @decoder_stack_kernel(%arg0: i32, %arg1: i32, %arg2: memref<1x8x32xf32, #tpu.memory_space<vmem>>, %arg3: memref<1x32x96xbf16, #tpu.memory_space<vmem>>, %arg4: memref<1x1x96xf32, #tpu.memory_space<vmem>>, %arg5: memref<1x32x32xbf16, #tpu.memory_space<vmem>>, %arg6: memref<1x1x32xf32, #tpu.memory_space<vmem>>, %arg7: memref<1x32x32xbf16, #tpu.memory_space<vmem>>, %arg8: memref<1x1x32xf32, #tpu.memory_space<vmem>>, %arg9: memref<1x32x64xbf16, #tpu.memory_space<vmem>>, %arg10: memref<1x1x64xf32, #tpu.memory_space<vmem>>, %arg11: memref<1x32x32xbf16, #tpu.memory_space<vmem>>, %arg12: memref<1x1x32xf32, #tpu.memory_space<vmem>>, %arg13: memref<1x32x64xbf16, #tpu.memory_space<vmem>>, %arg14: memref<1x1x64xf32, #tpu.memory_space<vmem>>, %arg15: memref<1x64x32xbf16, #tpu.memory_space<vmem>>, %arg16: memref<1x1x32xf32, #tpu.memory_space<vmem>>, %arg17: memref<1x1x32xf32, #tpu.memory_space<vmem>>, %arg18: memref<1x1x32xf32, #tpu.memory_space<vmem>>, %arg19: memref<1x1x32xf32, #tpu.memory_space<vmem>>, %arg20: memref<1x1x32xf32, #tpu.memory_space<vmem>>, %arg21: memref<1x1x32xf32, #tpu.memory_space<vmem>>, %arg22: memref<1x1x32xf32, #tpu.memory_space<vmem>>, %arg23: memref<1x8x32xf32, #tpu.memory_space<vmem>>, %arg24: memref<8x32xf32, #tpu.memory_space<vmem>>, %arg25: memref<8x32xf32, #tpu.memory_space<vmem>>) attributes {dimension_semantics = [#tpu.dimension_semantics<parallel>, #tpu.dimension_semantics<arbitrary>], iteration_bounds = array<i64: 2, 2>, scalar_prefetch = 0 : i64, scratch_operands = 2 : i64, tpu.core_type = #tpu.core_type<tc>, window_params = [{transform_indices = @transform_0, window_bounds = array<i64: 1, 8, 32>}, {transform_indices = @transform_1, window_bounds = array<i64: 1, 32, 96>}, {transform_indices = @transform_2, window_bounds = array<i64: 1, 1, 96>}, {transform_indices = @transform_3, window_bounds = array<i64: 1, 32, 32>}, {transform_indices = @transform_4, window_bounds = array<i64: 1, 1, 32>}, {transform_indices = @transform_5, window_bounds = array<i64: 1, 32, 32>}, {transform_indices = @transform_6, window_bounds = array<i64: 1, 1, 32>}, {transform_indices = @transform_7, window_bounds = array<i64: 1, 32, 64>}, {transform_indices = @transform_8, window_bounds = array<i64: 1, 1, 64>}, {transform_indices = @transform_9, window_bounds = array<i64: 1, 32, 32>}, {transform_indices = @transform_10, window_bounds = array<i64: 1, 1, 32>}, {transform_indices = @transform_11, window_bounds = array<i64: 1, 32, 64>}, {transform_indices = @transform_12, window_bounds = array<i64: 1, 1, 64>}, {transform_indices = @transform_13, window_bounds = array<i64: 1, 64, 32>}, {transform_indices = @transform_14, window_bounds = array<i64: 1, 1, 32>}, {transform_indices = @transform_15, window_bounds = array<i64: 1, 1, 32>}, {transform_indices = @transform_16, window_bounds = array<i64: 1, 1, 32>}, {transform_indices = @transform_17, window_bounds = array<i64: 1, 1, 32>}, {transform_indices = @transform_18, window_bounds = array<i64: 1, 1, 32>}, {transform_indices = @transform_19, window_bounds = array<i64: 1, 1, 32>}, {transform_indices = @transform_20, window_bounds = array<i64: 1, 1, 32>}, {transform_indices = @transform_21, window_bounds = array<i64: 1, 8, 32>}]} {
    %c0_i32 = arith.constant 0 : i32
    %0 = arith.cmpi eq, %arg1, %c0_i32 : i32
    %1 = arith.extui %0 : i1 to i32
    %c0_i32_0 = arith.constant 0 : i32
    %2 = arith.cmpi ne, %1, %c0_i32_0 : i32
    scf.if %2 {
      %c0_139 = arith.constant 0 : index
      %c0_140 = arith.constant 0 : index
      %c0_141 = arith.constant 0 : index
      %316 = vector.load %arg2[%c0_139, %c0_140, %c0_141] : memref<1x8x32xf32, #tpu.memory_space<vmem>>, vector<1x8x32xf32>
      %317 = vector.shape_cast %316 : vector<1x8x32xf32> to vector<8x32xf32>
      %c0_142 = arith.constant 0 : index
      %c0_143 = arith.constant 0 : index
      %318 = vector.load %arg24[%c0_142, %c0_143] : memref<8x32xf32, #tpu.memory_space<vmem>>, vector<8x32xf32>
      tpu.vector_store %arg24[%c0_142, %c0_143], %317 {strides = array<i32>} : memref<8x32xf32, #tpu.memory_space<vmem>>, vector<8x32xf32>,
    } else {
    }
    %c0 = arith.constant 0 : index
    %c0_1 = arith.constant 0 : index
    %3 = vector.load %arg24[%c0, %c0_1] : memref<8x32xf32, #tpu.memory_space<vmem>>, vector<8x32xf32>
    %c0_2 = arith.constant 0 : index
    %c0_3 = arith.constant 0 : index
    %c0_4 = arith.constant 0 : index
    %4 = vector.load %arg2[%c0_2, %c0_3, %c0_4] : memref<1x8x32xf32, #tpu.memory_space<vmem>>, vector<1x8x32xf32>
    %5 = vector.shape_cast %4 : vector<1x8x32xf32> to vector<8x32xf32>
    %6 = arith.truncf %3 : vector<8x32xf32> to vector<8x32xbf16>
    %c0_5 = arith.constant 0 : index
    %c0_6 = arith.constant 0 : index
    %c0_7 = arith.constant 0 : index
    %7 = vector.load %arg3[%c0_5, %c0_6, %c0_7] : memref<1x32x96xbf16, #tpu.memory_space<vmem>>, vector<1x32x96xbf16>
    %8 = vector.shape_cast %7 : vector<1x32x96xbf16> to vector<32x96xbf16>
    %cst = arith.constant dense<0.000000e+00> : vector<8x96xf32>
    %9 = tpu.matmul %6, %8, %cst {dimension_numbers = #tpu.dot_dimension_numbers<[1], [0], [0], [1], [0, 0, 1, 1], [], []>} : vector<8x32xbf16>, vector<32x96xbf16>, vector<8x96xf32> -> vector<8x96xf32>
    %c0_8 = arith.constant 0 : index
    %c0_9 = arith.constant 0 : index
    %c0_10 = arith.constant 0 : index
    %10 = vector.load %arg4[%c0_8, %c0_9, %c0_10] : memref<1x1x96xf32, #tpu.memory_space<vmem>>, vector<1x1x96xf32>
    %11 = vector.shape_cast %10 : vector<1x1x96xf32> to vector<1x96xf32>
    %12 = vector.broadcast %11 : vector<1x96xf32> to vector<8x96xf32>
    %13 = arith.addf %9, %12 : vector<8x96xf32>
    %14 = vector.extract_strided_slice %13 {offsets = [0, 0], sizes = [8, 32], strides = [1, 1]} : vector<8x96xf32> to vector<8x32xf32>
    %15 = vector.extract_strided_slice %13 {offsets = [0, 32], sizes = [8, 32], strides = [1, 1]} : vector<8x96xf32> to vector<8x32xf32>
    %16 = vector.extract_strided_slice %13 {offsets = [0, 64], sizes = [8, 32], strides = [1, 1]} : vector<8x96xf32> to vector<8x32xf32>
    %c0_11 = arith.constant 0 : index
    %c0_12 = arith.constant 0 : index
    %c0_13 = arith.constant 0 : index
    %17 = vector.load %arg5[%c0_11, %c0_12, %c0_13] : memref<1x32x32xbf16, #tpu.memory_space<vmem>>, vector<1x32x32xbf16>
    %18 = vector.shape_cast %17 : vector<1x32x32xbf16> to vector<32x32xbf16>
    %c0_14 = arith.constant 0 : index
    %c0_15 = arith.constant 0 : index
    %c0_16 = arith.constant 0 : index
    %19 = vector.load %arg6[%c0_14, %c0_15, %c0_16] : memref<1x1x32xf32, #tpu.memory_space<vmem>>, vector<1x1x32xf32>
    %20 = vector.shape_cast %19 : vector<1x1x32xf32> to vector<1x32xf32>
    %21 = vector.extract_strided_slice %14 {offsets = [0, 0], sizes = [8, 8], strides = [1, 1]} : vector<8x32xf32> to vector<8x8xf32>
    %22 = arith.truncf %21 : vector<8x8xf32> to vector<8x8xbf16>
    %23 = vector.extract_strided_slice %15 {offsets = [0, 0], sizes = [8, 8], strides = [1, 1]} : vector<8x32xf32> to vector<8x8xf32>
    %24 = arith.truncf %23 : vector<8x8xf32> to vector<8x8xbf16>
    %25 = vector.extract_strided_slice %16 {offsets = [0, 0], sizes = [8, 8], strides = [1, 1]} : vector<8x32xf32> to vector<8x8xf32>
    %26 = arith.truncf %25 : vector<8x8xf32> to vector<8x8xbf16>
    %cst_17 = arith.constant dense<0.000000e+00> : vector<8x8xf32>
    %27 = tpu.matmul %22, %24, %cst_17 {dimension_numbers = #tpu.dot_dimension_numbers<[1], [1], [0], [0], [0, 0, 1, 0], [], []>} : vector<8x8xbf16>, vector<8x8xbf16>, vector<8x8xf32> -> vector<8x8xf32>
    %cst_18 = arith.constant dense<0xFF800000> : vector<8xf32>
    %28 = vector.multi_reduction <maximumf>, %27, %cst_18 [1] : vector<8x8xf32> to vector<8xf32>
    %29 = vector.shape_cast %28 : vector<8xf32> to vector<8x1xf32>
    %30 = vector.broadcast %29 : vector<8x1xf32> to vector<8x8xf32>
    %31 = arith.subf %27, %30 : vector<8x8xf32>
    %32 = math.exp %31 : vector<8x8xf32>
    %cst_19 = arith.constant dense<0.000000e+00> : vector<8xf32>
    %33 = vector.multi_reduction <add>, %32, %cst_19 [1] : vector<8x8xf32> to vector<8xf32>
    %34 = vector.shape_cast %33 : vector<8xf32> to vector<8x1xf32>
    %35 = tpu.reciprocal %34 {approx = true} : vector<8x1xf32> -> vector<8x1xf32>
    %36 = vector.broadcast %35 : vector<8x1xf32> to vector<8x8xf32>
    %37 = arith.mulf %32, %36 : vector<8x8xf32>
    %38 = arith.truncf %37 : vector<8x8xf32> to vector<8x8xbf16>
    %cst_20 = arith.constant dense<0.000000e+00> : vector<8x8xf32>
    %39 = tpu.matmul %38, %26, %cst_20 {dimension_numbers = #tpu.dot_dimension_numbers<[1], [0], [0], [1], [0, 0, 1, 1], [], []>} : vector<8x8xbf16>, vector<8x8xbf16>, vector<8x8xf32> -> vector<8x8xf32>
    %c0_21 = arith.constant 0 : index
    %c0_22 = arith.constant 0 : index
    %40 = vector.load %arg25[%c0_21, %c0_22] : memref<8x32xf32, #tpu.memory_space<vmem>>, vector<8x8xf32>
    tpu.vector_store %arg25[%c0_21, %c0_22], %39 {strides = array<i32>} : memref<8x32xf32, #tpu.memory_space<vmem>>, vector<8x8xf32>,
    %41 = vector.extract_strided_slice %14 {offsets = [0, 8], sizes = [8, 8], strides = [1, 1]} : vector<8x32xf32> to vector<8x8xf32>
    %42 = arith.truncf %41 : vector<8x8xf32> to vector<8x8xbf16>
    %43 = vector.extract_strided_slice %15 {offsets = [0, 8], sizes = [8, 8], strides = [1, 1]} : vector<8x32xf32> to vector<8x8xf32>
    %44 = arith.truncf %43 : vector<8x8xf32> to vector<8x8xbf16>
    %45 = vector.extract_strided_slice %16 {offsets = [0, 8], sizes = [8, 8], strides = [1, 1]} : vector<8x32xf32> to vector<8x8xf32>
    %46 = arith.truncf %45 : vector<8x8xf32> to vector<8x8xbf16>
    %cst_23 = arith.constant dense<0.000000e+00> : vector<8x8xf32>
    %47 = tpu.matmul %42, %44, %cst_23 {dimension_numbers = #tpu.dot_dimension_numbers<[1], [1], [0], [0], [0, 0, 1, 0], [], []>} : vector<8x8xbf16>, vector<8x8xbf16>, vector<8x8xf32> -> vector<8x8xf32>
    %cst_24 = arith.constant dense<0xFF800000> : vector<8xf32>
    %48 = vector.multi_reduction <maximumf>, %47, %cst_24 [1] : vector<8x8xf32> to vector<8xf32>
    %49 = vector.shape_cast %48 : vector<8xf32> to vector<8x1xf32>
    %50 = vector.broadcast %49 : vector<8x1xf32> to vector<8x8xf32>
    %51 = arith.subf %47, %50 : vector<8x8xf32>
    %52 = math.exp %51 : vector<8x8xf32>
    %cst_25 = arith.constant dense<0.000000e+00> : vector<8xf32>
    %53 = vector.multi_reduction <add>, %52, %cst_25 [1] : vector<8x8xf32> to vector<8xf32>
    %54 = vector.shape_cast %53 : vector<8xf32> to vector<8x1xf32>
    %55 = tpu.reciprocal %54 {approx = true} : vector<8x1xf32> -> vector<8x1xf32>
    %56 = vector.broadcast %55 : vector<8x1xf32> to vector<8x8xf32>
    %57 = arith.mulf %52, %56 : vector<8x8xf32>
    %58 = arith.truncf %57 : vector<8x8xf32> to vector<8x8xbf16>
    %cst_26 = arith.constant dense<0.000000e+00> : vector<8x8xf32>
    %59 = tpu.matmul %58, %46, %cst_26 {dimension_numbers = #tpu.dot_dimension_numbers<[1], [0], [0], [1], [0, 0, 1, 1], [], []>} : vector<8x8xbf16>, vector<8x8xbf16>, vector<8x8xf32> -> vector<8x8xf32>
    %c0_27 = arith.constant 0 : index
    %c8 = arith.constant 8 : index
    %60 = vector.load %arg25[%c0_27, %c8] : memref<8x32xf32, #tpu.memory_space<vmem>>, vector<8x8xf32>
    tpu.vector_store %arg25[%c0_27, %c8], %59 {strides = array<i32>} : memref<8x32xf32, #tpu.memory_space<vmem>>, vector<8x8xf32>,
    %61 = vector.extract_strided_slice %14 {offsets = [0, 16], sizes = [8, 8], strides = [1, 1]} : vector<8x32xf32> to vector<8x8xf32>
    %62 = arith.truncf %61 : vector<8x8xf32> to vector<8x8xbf16>
    %63 = vector.extract_strided_slice %15 {offsets = [0, 16], sizes = [8, 8], strides = [1, 1]} : vector<8x32xf32> to vector<8x8xf32>
    %64 = arith.truncf %63 : vector<8x8xf32> to vector<8x8xbf16>
    %65 = vector.extract_strided_slice %16 {offsets = [0, 16], sizes = [8, 8], strides = [1, 1]} : vector<8x32xf32> to vector<8x8xf32>
    %66 = arith.truncf %65 : vector<8x8xf32> to vector<8x8xbf16>
    %cst_28 = arith.constant dense<0.000000e+00> : vector<8x8xf32>
    %67 = tpu.matmul %62, %64, %cst_28 {dimension_numbers = #tpu.dot_dimension_numbers<[1], [1], [0], [0], [0, 0, 1, 0], [], []>} : vector<8x8xbf16>, vector<8x8xbf16>, vector<8x8xf32> -> vector<8x8xf32>
    %cst_29 = arith.constant dense<0xFF800000> : vector<8xf32>
    %68 = vector.multi_reduction <maximumf>, %67, %cst_29 [1] : vector<8x8xf32> to vector<8xf32>
    %69 = vector.shape_cast %68 : vector<8xf32> to vector<8x1xf32>
    %70 = vector.broadcast %69 : vector<8x1xf32> to vector<8x8xf32>
    %71 = arith.subf %67, %70 : vector<8x8xf32>
    %72 = math.exp %71 : vector<8x8xf32>
    %cst_30 = arith.constant dense<0.000000e+00> : vector<8xf32>
    %73 = vector.multi_reduction <add>, %72, %cst_30 [1] : vector<8x8xf32> to vector<8xf32>
    %74 = vector.shape_cast %73 : vector<8xf32> to vector<8x1xf32>
    %75 = tpu.reciprocal %74 {approx = true} : vector<8x1xf32> -> vector<8x1xf32>
    %76 = vector.broadcast %75 : vector<8x1xf32> to vector<8x8xf32>
    %77 = arith.mulf %72, %76 : vector<8x8xf32>
    %78 = arith.truncf %77 : vector<8x8xf32> to vector<8x8xbf16>
    %cst_31 = arith.constant dense<0.000000e+00> : vector<8x8xf32>
    %79 = tpu.matmul %78, %66, %cst_31 {dimension_numbers = #tpu.dot_dimension_numbers<[1], [0], [0], [1], [0, 0, 1, 1], [], []>} : vector<8x8xbf16>, vector<8x8xbf16>, vector<8x8xf32> -> vector<8x8xf32>
    %c0_32 = arith.constant 0 : index
    %c16 = arith.constant 16 : index
    %80 = vector.load %arg25[%c0_32, %c16] : memref<8x32xf32, #tpu.memory_space<vmem>>, vector<8x8xf32>
    tpu.vector_store %arg25[%c0_32, %c16], %79 {strides = array<i32>} : memref<8x32xf32, #tpu.memory_space<vmem>>, vector<8x8xf32>,
    %81 = vector.extract_strided_slice %14 {offsets = [0, 24], sizes = [8, 8], strides = [1, 1]} : vector<8x32xf32> to vector<8x8xf32>
    %82 = arith.truncf %81 : vector<8x8xf32> to vector<8x8xbf16>
    %83 = vector.extract_strided_slice %15 {offsets = [0, 24], sizes = [8, 8], strides = [1, 1]} : vector<8x32xf32> to vector<8x8xf32>
    %84 = arith.truncf %83 : vector<8x8xf32> to vector<8x8xbf16>
    %85 = vector.extract_strided_slice %16 {offsets = [0, 24], sizes = [8, 8], strides = [1, 1]} : vector<8x32xf32> to vector<8x8xf32>
    %86 = arith.truncf %85 : vector<8x8xf32> to vector<8x8xbf16>
    %cst_33 = arith.constant dense<0.000000e+00> : vector<8x8xf32>
    %87 = tpu.matmul %82, %84, %cst_33 {dimension_numbers = #tpu.dot_dimension_numbers<[1], [1], [0], [0], [0, 0, 1, 0], [], []>} : vector<8x8xbf16>, vector<8x8xbf16>, vector<8x8xf32> -> vector<8x8xf32>
    %cst_34 = arith.constant dense<0xFF800000> : vector<8xf32>
    %88 = vector.multi_reduction <maximumf>, %87, %cst_34 [1] : vector<8x8xf32> to vector<8xf32>
    %89 = vector.shape_cast %88 : vector<8xf32> to vector<8x1xf32>
    %90 = vector.broadcast %89 : vector<8x1xf32> to vector<8x8xf32>
    %91 = arith.subf %87, %90 : vector<8x8xf32>
    %92 = math.exp %91 : vector<8x8xf32>
    %cst_35 = arith.constant dense<0.000000e+00> : vector<8xf32>
    %93 = vector.multi_reduction <add>, %92, %cst_35 [1] : vector<8x8xf32> to vector<8xf32>
    %94 = vector.shape_cast %93 : vector<8xf32> to vector<8x1xf32>
    %95 = tpu.reciprocal %94 {approx = true} : vector<8x1xf32> -> vector<8x1xf32>
    %96 = vector.broadcast %95 : vector<8x1xf32> to vector<8x8xf32>
    %97 = arith.mulf %92, %96 : vector<8x8xf32>
    %98 = arith.truncf %97 : vector<8x8xf32> to vector<8x8xbf16>
    %cst_36 = arith.constant dense<0.000000e+00> : vector<8x8xf32>
    %99 = tpu.matmul %98, %86, %cst_36 {dimension_numbers = #tpu.dot_dimension_numbers<[1], [0], [0], [1], [0, 0, 1, 1], [], []>} : vector<8x8xbf16>, vector<8x8xbf16>, vector<8x8xf32> -> vector<8x8xf32>
    %c0_37 = arith.constant 0 : index
    %c24 = arith.constant 24 : index
    %100 = vector.load %arg25[%c0_37, %c24] : memref<8x32xf32, #tpu.memory_space<vmem>>, vector<8x8xf32>
    tpu.vector_store %arg25[%c0_37, %c24], %99 {strides = array<i32>} : memref<8x32xf32, #tpu.memory_space<vmem>>, vector<8x8xf32>,
    %c0_38 = arith.constant 0 : index
    %c0_39 = arith.constant 0 : index
    %101 = vector.load %arg25[%c0_38, %c0_39] : memref<8x32xf32, #tpu.memory_space<vmem>>, vector<8x32xf32>
    %102 = arith.truncf %101 : vector<8x32xf32> to vector<8x32xbf16>
    %cst_40 = arith.constant dense<0.000000e+00> : vector<8x32xf32>
    %103 = tpu.matmul %102, %18, %cst_40 {dimension_numbers = #tpu.dot_dimension_numbers<[1], [0], [0], [1], [0, 0, 1, 1], [], []>} : vector<8x32xbf16>, vector<32x32xbf16>, vector<8x32xf32> -> vector<8x32xf32>
    %104 = vector.broadcast %20 : vector<1x32xf32> to vector<8x32xf32>
    %105 = arith.addf %103, %104 : vector<8x32xf32>
    %106 = arith.addf %3, %105 : vector<8x32xf32>
    %c0_41 = arith.constant 0 : index
    %c0_42 = arith.constant 0 : index
    %c0_43 = arith.constant 0 : index
    %107 = vector.load %arg17[%c0_41, %c0_42, %c0_43] : memref<1x1x32xf32, #tpu.memory_space<vmem>>, vector<1x1x32xf32>
    %108 = vector.shape_cast %107 : vector<1x1x32xf32> to vector<1x32xf32>
    %c0_44 = arith.constant 0 : index
    %c0_45 = arith.constant 0 : index
    %c0_46 = arith.constant 0 : index
    %109 = vector.load %arg18[%c0_44, %c0_45, %c0_46] : memref<1x1x32xf32, #tpu.memory_space<vmem>>, vector<1x1x32xf32>
    %110 = vector.shape_cast %109 : vector<1x1x32xf32> to vector<1x32xf32>
    %cst_47 = arith.constant dense<0.000000e+00> : vector<8xf32>
    %111 = vector.multi_reduction <add>, %106, %cst_47 [1] : vector<8x32xf32> to vector<8xf32>
    %112 = vector.shape_cast %111 : vector<8xf32> to vector<8x1xf32>
    %cst_48 = arith.constant 3.200000e+01 : f32
    %113 = vector.broadcast %cst_48 : f32 to vector<8x1xf32>
    %114 = arith.divf %112, %113 : vector<8x1xf32>
    %115 = vector.broadcast %114 : vector<8x1xf32> to vector<8x32xf32>
    %116 = arith.subf %106, %115 : vector<8x32xf32>
    %117 = arith.mulf %116, %116 : vector<8x32xf32>
    %cst_49 = arith.constant dense<0.000000e+00> : vector<8xf32>
    %118 = vector.multi_reduction <add>, %117, %cst_49 [1] : vector<8x32xf32> to vector<8xf32>
    %119 = vector.shape_cast %118 : vector<8xf32> to vector<8x1xf32>
    %cst_50 = arith.constant 3.200000e+01 : f32
    %120 = vector.broadcast %cst_50 : f32 to vector<8x1xf32>
    %121 = arith.divf %119, %120 : vector<8x1xf32>
    %122 = vector.broadcast %114 : vector<8x1xf32> to vector<8x32xf32>
    %123 = arith.subf %106, %122 : vector<8x32xf32>
    %cst_51 = arith.constant 9.99999974E-6 : f32
    %124 = vector.broadcast %cst_51 : f32 to vector<8x1xf32>
    %125 = arith.addf %121, %124 : vector<8x1xf32>
    %126 = math.rsqrt %125 : vector<8x1xf32>
    %127 = vector.broadcast %126 : vector<8x1xf32> to vector<8x32xf32>
    %128 = arith.mulf %123, %127 : vector<8x32xf32>
    %129 = vector.broadcast %108 : vector<1x32xf32> to vector<8x32xf32>
    %130 = arith.mulf %128, %129 : vector<8x32xf32>
    %131 = vector.broadcast %110 : vector<1x32xf32> to vector<8x32xf32>
    %132 = arith.addf %130, %131 : vector<8x32xf32>
    %133 = arith.truncf %132 : vector<8x32xf32> to vector<8x32xbf16>
    %c0_52 = arith.constant 0 : index
    %c0_53 = arith.constant 0 : index
    %c0_54 = arith.constant 0 : index
    %134 = vector.load %arg7[%c0_52, %c0_53, %c0_54] : memref<1x32x32xbf16, #tpu.memory_space<vmem>>, vector<1x32x32xbf16>
    %135 = vector.shape_cast %134 : vector<1x32x32xbf16> to vector<32x32xbf16>
    %cst_55 = arith.constant dense<0.000000e+00> : vector<8x32xf32>
    %136 = tpu.matmul %133, %135, %cst_55 {dimension_numbers = #tpu.dot_dimension_numbers<[1], [0], [0], [1], [0, 0, 1, 1], [], []>} : vector<8x32xbf16>, vector<32x32xbf16>, vector<8x32xf32> -> vector<8x32xf32>
    %c0_56 = arith.constant 0 : index
    %c0_57 = arith.constant 0 : index
    %c0_58 = arith.constant 0 : index
    %137 = vector.load %arg8[%c0_56, %c0_57, %c0_58] : memref<1x1x32xf32, #tpu.memory_space<vmem>>, vector<1x1x32xf32>
    %138 = vector.shape_cast %137 : vector<1x1x32xf32> to vector<1x32xf32>
    %139 = vector.broadcast %138 : vector<1x32xf32> to vector<8x32xf32>
    %140 = arith.addf %136, %139 : vector<8x32xf32>
    %141 = arith.truncf %5 : vector<8x32xf32> to vector<8x32xbf16>
    %c0_59 = arith.constant 0 : index
    %c0_60 = arith.constant 0 : index
    %c0_61 = arith.constant 0 : index
    %142 = vector.load %arg9[%c0_59, %c0_60, %c0_61] : memref<1x32x64xbf16, #tpu.memory_space<vmem>>, vector<1x32x64xbf16>
    %143 = vector.shape_cast %142 : vector<1x32x64xbf16> to vector<32x64xbf16>
    %cst_62 = arith.constant dense<0.000000e+00> : vector<8x64xf32>
    %144 = tpu.matmul %141, %143, %cst_62 {dimension_numbers = #tpu.dot_dimension_numbers<[1], [0], [0], [1], [0, 0, 1, 1], [], []>} : vector<8x32xbf16>, vector<32x64xbf16>, vector<8x64xf32> -> vector<8x64xf32>
    %c0_63 = arith.constant 0 : index
    %c0_64 = arith.constant 0 : index
    %c0_65 = arith.constant 0 : index
    %145 = vector.load %arg10[%c0_63, %c0_64, %c0_65] : memref<1x1x64xf32, #tpu.memory_space<vmem>>, vector<1x1x64xf32>
    %146 = vector.shape_cast %145 : vector<1x1x64xf32> to vector<1x64xf32>
    %147 = vector.broadcast %146 : vector<1x64xf32> to vector<8x64xf32>
    %148 = arith.addf %144, %147 : vector<8x64xf32>
    %149 = vector.extract_strided_slice %148 {offsets = [0, 0], sizes = [8, 32], strides = [1, 1]} : vector<8x64xf32> to vector<8x32xf32>
    %150 = vector.extract_strided_slice %148 {offsets = [0, 32], sizes = [8, 32], strides = [1, 1]} : vector<8x64xf32> to vector<8x32xf32>
    %c0_66 = arith.constant 0 : index
    %c0_67 = arith.constant 0 : index
    %c0_68 = arith.constant 0 : index
    %151 = vector.load %arg11[%c0_66, %c0_67, %c0_68] : memref<1x32x32xbf16, #tpu.memory_space<vmem>>, vector<1x32x32xbf16>
    %152 = vector.shape_cast %151 : vector<1x32x32xbf16> to vector<32x32xbf16>
    %c0_69 = arith.constant 0 : index
    %c0_70 = arith.constant 0 : index
    %c0_71 = arith.constant 0 : index
    %153 = vector.load %arg12[%c0_69, %c0_70, %c0_71] : memref<1x1x32xf32, #tpu.memory_space<vmem>>, vector<1x1x32xf32>
    %154 = vector.shape_cast %153 : vector<1x1x32xf32> to vector<1x32xf32>
    %155 = vector.extract_strided_slice %140 {offsets = [0, 0], sizes = [8, 8], strides = [1, 1]} : vector<8x32xf32> to vector<8x8xf32>
    %156 = arith.truncf %155 : vector<8x8xf32> to vector<8x8xbf16>
    %157 = vector.extract_strided_slice %149 {offsets = [0, 0], sizes = [8, 8], strides = [1, 1]} : vector<8x32xf32> to vector<8x8xf32>
    %158 = arith.truncf %157 : vector<8x8xf32> to vector<8x8xbf16>
    %159 = vector.extract_strided_slice %150 {offsets = [0, 0], sizes = [8, 8], strides = [1, 1]} : vector<8x32xf32> to vector<8x8xf32>
    %160 = arith.truncf %159 : vector<8x8xf32> to vector<8x8xbf16>
    %cst_72 = arith.constant dense<0.000000e+00> : vector<8x8xf32>
    %161 = tpu.matmul %156, %158, %cst_72 {dimension_numbers = #tpu.dot_dimension_numbers<[1], [1], [0], [0], [0, 0, 1, 0], [], []>} : vector<8x8xbf16>, vector<8x8xbf16>, vector<8x8xf32> -> vector<8x8xf32>
    %cst_73 = arith.constant dense<0xFF800000> : vector<8xf32>
    %162 = vector.multi_reduction <maximumf>, %161, %cst_73 [1] : vector<8x8xf32> to vector<8xf32>
    %163 = vector.shape_cast %162 : vector<8xf32> to vector<8x1xf32>
    %164 = vector.broadcast %163 : vector<8x1xf32> to vector<8x8xf32>
    %165 = arith.subf %161, %164 : vector<8x8xf32>
    %166 = math.exp %165 : vector<8x8xf32>
    %cst_74 = arith.constant dense<0.000000e+00> : vector<8xf32>
    %167 = vector.multi_reduction <add>, %166, %cst_74 [1] : vector<8x8xf32> to vector<8xf32>
    %168 = vector.shape_cast %167 : vector<8xf32> to vector<8x1xf32>
    %169 = tpu.reciprocal %168 {approx = true} : vector<8x1xf32> -> vector<8x1xf32>
    %170 = vector.broadcast %169 : vector<8x1xf32> to vector<8x8xf32>
    %171 = arith.mulf %166, %170 : vector<8x8xf32>
    %172 = arith.truncf %171 : vector<8x8xf32> to vector<8x8xbf16>
    %cst_75 = arith.constant dense<0.000000e+00> : vector<8x8xf32>
    %173 = tpu.matmul %172, %160, %cst_75 {dimension_numbers = #tpu.dot_dimension_numbers<[1], [0], [0], [1], [0, 0, 1, 1], [], []>} : vector<8x8xbf16>, vector<8x8xbf16>, vector<8x8xf32> -> vector<8x8xf32>
    %c0_76 = arith.constant 0 : index
    %c0_77 = arith.constant 0 : index
    %174 = vector.load %arg25[%c0_76, %c0_77] : memref<8x32xf32, #tpu.memory_space<vmem>>, vector<8x8xf32>
    tpu.vector_store %arg25[%c0_76, %c0_77], %173 {strides = array<i32>} : memref<8x32xf32, #tpu.memory_space<vmem>>, vector<8x8xf32>,
    %175 = vector.extract_strided_slice %140 {offsets = [0, 8], sizes = [8, 8], strides = [1, 1]} : vector<8x32xf32> to vector<8x8xf32>
    %176 = arith.truncf %175 : vector<8x8xf32> to vector<8x8xbf16>
    %177 = vector.extract_strided_slice %149 {offsets = [0, 8], sizes = [8, 8], strides = [1, 1]} : vector<8x32xf32> to vector<8x8xf32>
    %178 = arith.truncf %177 : vector<8x8xf32> to vector<8x8xbf16>
    %179 = vector.extract_strided_slice %150 {offsets = [0, 8], sizes = [8, 8], strides = [1, 1]} : vector<8x32xf32> to vector<8x8xf32>
    %180 = arith.truncf %179 : vector<8x8xf32> to vector<8x8xbf16>
    %cst_78 = arith.constant dense<0.000000e+00> : vector<8x8xf32>
    %181 = tpu.matmul %176, %178, %cst_78 {dimension_numbers = #tpu.dot_dimension_numbers<[1], [1], [0], [0], [0, 0, 1, 0], [], []>} : vector<8x8xbf16>, vector<8x8xbf16>, vector<8x8xf32> -> vector<8x8xf32>
    %cst_79 = arith.constant dense<0xFF800000> : vector<8xf32>
    %182 = vector.multi_reduction <maximumf>, %181, %cst_79 [1] : vector<8x8xf32> to vector<8xf32>
    %183 = vector.shape_cast %182 : vector<8xf32> to vector<8x1xf32>
    %184 = vector.broadcast %183 : vector<8x1xf32> to vector<8x8xf32>
    %185 = arith.subf %181, %184 : vector<8x8xf32>
    %186 = math.exp %185 : vector<8x8xf32>
    %cst_80 = arith.constant dense<0.000000e+00> : vector<8xf32>
    %187 = vector.multi_reduction <add>, %186, %cst_80 [1] : vector<8x8xf32> to vector<8xf32>
    %188 = vector.shape_cast %187 : vector<8xf32> to vector<8x1xf32>
    %189 = tpu.reciprocal %188 {approx = true} : vector<8x1xf32> -> vector<8x1xf32>
    %190 = vector.broadcast %189 : vector<8x1xf32> to vector<8x8xf32>
    %191 = arith.mulf %186, %190 : vector<8x8xf32>
    %192 = arith.truncf %191 : vector<8x8xf32> to vector<8x8xbf16>
    %cst_81 = arith.constant dense<0.000000e+00> : vector<8x8xf32>
    %193 = tpu.matmul %192, %180, %cst_81 {dimension_numbers = #tpu.dot_dimension_numbers<[1], [0], [0], [1], [0, 0, 1, 1], [], []>} : vector<8x8xbf16>, vector<8x8xbf16>, vector<8x8xf32> -> vector<8x8xf32>
    %c0_82 = arith.constant 0 : index
    %c8_83 = arith.constant 8 : index
    %194 = vector.load %arg25[%c0_82, %c8_83] : memref<8x32xf32, #tpu.memory_space<vmem>>, vector<8x8xf32>
    tpu.vector_store %arg25[%c0_82, %c8_83], %193 {strides = array<i32>} : memref<8x32xf32, #tpu.memory_space<vmem>>, vector<8x8xf32>,
    %195 = vector.extract_strided_slice %140 {offsets = [0, 16], sizes = [8, 8], strides = [1, 1]} : vector<8x32xf32> to vector<8x8xf32>
    %196 = arith.truncf %195 : vector<8x8xf32> to vector<8x8xbf16>
    %197 = vector.extract_strided_slice %149 {offsets = [0, 16], sizes = [8, 8], strides = [1, 1]} : vector<8x32xf32> to vector<8x8xf32>
    %198 = arith.truncf %197 : vector<8x8xf32> to vector<8x8xbf16>
    %199 = vector.extract_strided_slice %150 {offsets = [0, 16], sizes = [8, 8], strides = [1, 1]} : vector<8x32xf32> to vector<8x8xf32>
    %200 = arith.truncf %199 : vector<8x8xf32> to vector<8x8xbf16>
    %cst_84 = arith.constant dense<0.000000e+00> : vector<8x8xf32>
    %201 = tpu.matmul %196, %198, %cst_84 {dimension_numbers = #tpu.dot_dimension_numbers<[1], [1], [0], [0], [0, 0, 1, 0], [], []>} : vector<8x8xbf16>, vector<8x8xbf16>, vector<8x8xf32> -> vector<8x8xf32>
    %cst_85 = arith.constant dense<0xFF800000> : vector<8xf32>
    %202 = vector.multi_reduction <maximumf>, %201, %cst_85 [1] : vector<8x8xf32> to vector<8xf32>
    %203 = vector.shape_cast %202 : vector<8xf32> to vector<8x1xf32>
    %204 = vector.broadcast %203 : vector<8x1xf32> to vector<8x8xf32>
    %205 = arith.subf %201, %204 : vector<8x8xf32>
    %206 = math.exp %205 : vector<8x8xf32>
    %cst_86 = arith.constant dense<0.000000e+00> : vector<8xf32>
    %207 = vector.multi_reduction <add>, %206, %cst_86 [1] : vector<8x8xf32> to vector<8xf32>
    %208 = vector.shape_cast %207 : vector<8xf32> to vector<8x1xf32>
    %209 = tpu.reciprocal %208 {approx = true} : vector<8x1xf32> -> vector<8x1xf32>
    %210 = vector.broadcast %209 : vector<8x1xf32> to vector<8x8xf32>
    %211 = arith.mulf %206, %210 : vector<8x8xf32>
    %212 = arith.truncf %211 : vector<8x8xf32> to vector<8x8xbf16>
    %cst_87 = arith.constant dense<0.000000e+00> : vector<8x8xf32>
    %213 = tpu.matmul %212, %200, %cst_87 {dimension_numbers = #tpu.dot_dimension_numbers<[1], [0], [0], [1], [0, 0, 1, 1], [], []>} : vector<8x8xbf16>, vector<8x8xbf16>, vector<8x8xf32> -> vector<8x8xf32>
    %c0_88 = arith.constant 0 : index
    %c16_89 = arith.constant 16 : index
    %214 = vector.load %arg25[%c0_88, %c16_89] : memref<8x32xf32, #tpu.memory_space<vmem>>, vector<8x8xf32>
    tpu.vector_store %arg25[%c0_88, %c16_89], %213 {strides = array<i32>} : memref<8x32xf32, #tpu.memory_space<vmem>>, vector<8x8xf32>,
    %215 = vector.extract_strided_slice %140 {offsets = [0, 24], sizes = [8, 8], strides = [1, 1]} : vector<8x32xf32> to vector<8x8xf32>
    %216 = arith.truncf %215 : vector<8x8xf32> to vector<8x8xbf16>
    %217 = vector.extract_strided_slice %149 {offsets = [0, 24], sizes = [8, 8], strides = [1, 1]} : vector<8x32xf32> to vector<8x8xf32>
    %218 = arith.truncf %217 : vector<8x8xf32> to vector<8x8xbf16>
    %219 = vector.extract_strided_slice %150 {offsets = [0, 24], sizes = [8, 8], strides = [1, 1]} : vector<8x32xf32> to vector<8x8xf32>
    %220 = arith.truncf %219 : vector<8x8xf32> to vector<8x8xbf16>
    %cst_90 = arith.constant dense<0.000000e+00> : vector<8x8xf32>
    %221 = tpu.matmul %216, %218, %cst_90 {dimension_numbers = #tpu.dot_dimension_numbers<[1], [1], [0], [0], [0, 0, 1, 0], [], []>} : vector<8x8xbf16>, vector<8x8xbf16>, vector<8x8xf32> -> vector<8x8xf32>
    %cst_91 = arith.constant dense<0xFF800000> : vector<8xf32>
    %222 = vector.multi_reduction <maximumf>, %221, %cst_91 [1] : vector<8x8xf32> to vector<8xf32>
    %223 = vector.shape_cast %222 : vector<8xf32> to vector<8x1xf32>
    %224 = vector.broadcast %223 : vector<8x1xf32> to vector<8x8xf32>
    %225 = arith.subf %221, %224 : vector<8x8xf32>
    %226 = math.exp %225 : vector<8x8xf32>
    %cst_92 = arith.constant dense<0.000000e+00> : vector<8xf32>
    %227 = vector.multi_reduction <add>, %226, %cst_92 [1] : vector<8x8xf32> to vector<8xf32>
    %228 = vector.shape_cast %227 : vector<8xf32> to vector<8x1xf32>
    %229 = tpu.reciprocal %228 {approx = true} : vector<8x1xf32> -> vector<8x1xf32>
    %230 = vector.broadcast %229 : vector<8x1xf32> to vector<8x8xf32>
    %231 = arith.mulf %226, %230 : vector<8x8xf32>
    %232 = arith.truncf %231 : vector<8x8xf32> to vector<8x8xbf16>
    %cst_93 = arith.constant dense<0.000000e+00> : vector<8x8xf32>
    %233 = tpu.matmul %232, %220, %cst_93 {dimension_numbers = #tpu.dot_dimension_numbers<[1], [0], [0], [1], [0, 0, 1, 1], [], []>} : vector<8x8xbf16>, vector<8x8xbf16>, vector<8x8xf32> -> vector<8x8xf32>
    %c0_94 = arith.constant 0 : index
    %c24_95 = arith.constant 24 : index
    %234 = vector.load %arg25[%c0_94, %c24_95] : memref<8x32xf32, #tpu.memory_space<vmem>>, vector<8x8xf32>
    tpu.vector_store %arg25[%c0_94, %c24_95], %233 {strides = array<i32>} : memref<8x32xf32, #tpu.memory_space<vmem>>, vector<8x8xf32>,
    %c0_96 = arith.constant 0 : index
    %c0_97 = arith.constant 0 : index
    %235 = vector.load %arg25[%c0_96, %c0_97] : memref<8x32xf32, #tpu.memory_space<vmem>>, vector<8x32xf32>
    %236 = arith.truncf %235 : vector<8x32xf32> to vector<8x32xbf16>
    %cst_98 = arith.constant dense<0.000000e+00> : vector<8x32xf32>
    %237 = tpu.matmul %236, %152, %cst_98 {dimension_numbers = #tpu.dot_dimension_numbers<[1], [0], [0], [1], [0, 0, 1, 1], [], []>} : vector<8x32xbf16>, vector<32x32xbf16>, vector<8x32xf32> -> vector<8x32xf32>
    %238 = vector.broadcast %154 : vector<1x32xf32> to vector<8x32xf32>
    %239 = arith.addf %237, %238 : vector<8x32xf32>
    %240 = arith.addf %132, %239 : vector<8x32xf32>
    %c0_99 = arith.constant 0 : index
    %c0_100 = arith.constant 0 : index
    %c0_101 = arith.constant 0 : index
    %241 = vector.load %arg19[%c0_99, %c0_100, %c0_101] : memref<1x1x32xf32, #tpu.memory_space<vmem>>, vector<1x1x32xf32>
    %242 = vector.shape_cast %241 : vector<1x1x32xf32> to vector<1x32xf32>
    %c0_102 = arith.constant 0 : index
    %c0_103 = arith.constant 0 : index
    %c0_104 = arith.constant 0 : index
    %243 = vector.load %arg20[%c0_102, %c0_103, %c0_104] : memref<1x1x32xf32, #tpu.memory_space<vmem>>, vector<1x1x32xf32>
    %244 = vector.shape_cast %243 : vector<1x1x32xf32> to vector<1x32xf32>
    %cst_105 = arith.constant dense<0.000000e+00> : vector<8xf32>
    %245 = vector.multi_reduction <add>, %240, %cst_105 [1] : vector<8x32xf32> to vector<8xf32>
    %246 = vector.shape_cast %245 : vector<8xf32> to vector<8x1xf32>
    %cst_106 = arith.constant 3.200000e+01 : f32
    %247 = vector.broadcast %cst_106 : f32 to vector<8x1xf32>
    %248 = arith.divf %246, %247 : vector<8x1xf32>
    %249 = vector.broadcast %248 : vector<8x1xf32> to vector<8x32xf32>
    %250 = arith.subf %240, %249 : vector<8x32xf32>
    %251 = arith.mulf %250, %250 : vector<8x32xf32>
    %cst_107 = arith.constant dense<0.000000e+00> : vector<8xf32>
    %252 = vector.multi_reduction <add>, %251, %cst_107 [1] : vector<8x32xf32> to vector<8xf32>
    %253 = vector.shape_cast %252 : vector<8xf32> to vector<8x1xf32>
    %cst_108 = arith.constant 3.200000e+01 : f32
    %254 = vector.broadcast %cst_108 : f32 to vector<8x1xf32>
    %255 = arith.divf %253, %254 : vector<8x1xf32>
    %256 = vector.broadcast %248 : vector<8x1xf32> to vector<8x32xf32>
    %257 = arith.subf %240, %256 : vector<8x32xf32>
    %cst_109 = arith.constant 9.99999974E-6 : f32
    %258 = vector.broadcast %cst_109 : f32 to vector<8x1xf32>
    %259 = arith.addf %255, %258 : vector<8x1xf32>
    %260 = math.rsqrt %259 : vector<8x1xf32>
    %261 = vector.broadcast %260 : vector<8x1xf32> to vector<8x32xf32>
    %262 = arith.mulf %257, %261 : vector<8x32xf32>
    %263 = vector.broadcast %242 : vector<1x32xf32> to vector<8x32xf32>
    %264 = arith.mulf %262, %263 : vector<8x32xf32>
    %265 = vector.broadcast %244 : vector<1x32xf32> to vector<8x32xf32>
    %266 = arith.addf %264, %265 : vector<8x32xf32>
    %267 = arith.truncf %266 : vector<8x32xf32> to vector<8x32xbf16>
    %c0_110 = arith.constant 0 : index
    %c0_111 = arith.constant 0 : index
    %c0_112 = arith.constant 0 : index
    %268 = vector.load %arg13[%c0_110, %c0_111, %c0_112] : memref<1x32x64xbf16, #tpu.memory_space<vmem>>, vector<1x32x64xbf16>
    %269 = vector.shape_cast %268 : vector<1x32x64xbf16> to vector<32x64xbf16>
    %cst_113 = arith.constant dense<0.000000e+00> : vector<8x64xf32>
    %270 = tpu.matmul %267, %269, %cst_113 {dimension_numbers = #tpu.dot_dimension_numbers<[1], [0], [0], [1], [0, 0, 1, 1], [], []>} : vector<8x32xbf16>, vector<32x64xbf16>, vector<8x64xf32> -> vector<8x64xf32>
    %c0_114 = arith.constant 0 : index
    %c0_115 = arith.constant 0 : index
    %c0_116 = arith.constant 0 : index
    %271 = vector.load %arg14[%c0_114, %c0_115, %c0_116] : memref<1x1x64xf32, #tpu.memory_space<vmem>>, vector<1x1x64xf32>
    %272 = vector.shape_cast %271 : vector<1x1x64xf32> to vector<1x64xf32>
    %273 = vector.broadcast %272 : vector<1x64xf32> to vector<8x64xf32>
    %274 = arith.addf %270, %273 : vector<8x64xf32>
    %cst_117 = arith.constant 0.000000e+00 : f32
    %275 = vector.broadcast %cst_117 : f32 to vector<8x64xf32>
    %276 = arith.maximumf %274, %275 : vector<8x64xf32>
    %277 = arith.truncf %276 : vector<8x64xf32> to vector<8x64xbf16>
    %c0_118 = arith.constant 0 : index
    %c0_119 = arith.constant 0 : index
    %c0_120 = arith.constant 0 : index
    %278 = vector.load %arg15[%c0_118, %c0_119, %c0_120] : memref<1x64x32xbf16, #tpu.memory_space<vmem>>, vector<1x64x32xbf16>
    %279 = vector.shape_cast %278 : vector<1x64x32xbf16> to vector<64x32xbf16>
    %cst_121 = arith.constant dense<0.000000e+00> : vector<8x32xf32>
    %280 = tpu.matmul %277, %279, %cst_121 {dimension_numbers = #tpu.dot_dimension_numbers<[1], [0], [0], [1], [0, 0, 1, 1], [], []>} : vector<8x64xbf16>, vector<64x32xbf16>, vector<8x32xf32> -> vector<8x32xf32>
    %c0_122 = arith.constant 0 : index
    %c0_123 = arith.constant 0 : index
    %c0_124 = arith.constant 0 : index
    %281 = vector.load %arg16[%c0_122, %c0_123, %c0_124] : memref<1x1x32xf32, #tpu.memory_space<vmem>>, vector<1x1x32xf32>
    %282 = vector.shape_cast %281 : vector<1x1x32xf32> to vector<1x32xf32>
    %283 = vector.broadcast %282 : vector<1x32xf32> to vector<8x32xf32>
    %284 = arith.addf %280, %283 : vector<8x32xf32>
    %285 = arith.addf %266, %284 : vector<8x32xf32>
    %c0_125 = arith.constant 0 : index
    %c0_126 = arith.constant 0 : index
    %c0_127 = arith.constant 0 : index
    %286 = vector.load %arg21[%c0_125, %c0_126, %c0_127] : memref<1x1x32xf32, #tpu.memory_space<vmem>>, vector<1x1x32xf32>
    %287 = vector.shape_cast %286 : vector<1x1x32xf32> to vector<1x32xf32>
    %c0_128 = arith.constant 0 : index
    %c0_129 = arith.constant 0 : index
    %c0_130 = arith.constant 0 : index
    %288 = vector.load %arg22[%c0_128, %c0_129, %c0_130] : memref<1x1x32xf32, #tpu.memory_space<vmem>>, vector<1x1x32xf32>
    %289 = vector.shape_cast %288 : vector<1x1x32xf32> to vector<1x32xf32>
    %cst_131 = arith.constant dense<0.000000e+00> : vector<8xf32>
    %290 = vector.multi_reduction <add>, %285, %cst_131 [1] : vector<8x32xf32> to vector<8xf32>
    %291 = vector.shape_cast %290 : vector<8xf32> to vector<8x1xf32>
    %cst_132 = arith.constant 3.200000e+01 : f32
    %292 = vector.broadcast %cst_132 : f32 to vector<8x1xf32>
    %293 = arith.divf %291, %292 : vector<8x1xf32>
    %294 = vector.broadcast %293 : vector<8x1xf32> to vector<8x32xf32>
    %295 = arith.subf %285, %294 : vector<8x32xf32>
    %296 = arith.mulf %295, %295 : vector<8x32xf32>
    %cst_133 = arith.constant dense<0.000000e+00> : vector<8xf32>
    %297 = vector.multi_reduction <add>, %296, %cst_133 [1] : vector<8x32xf32> to vector<8xf32>
    %298 = vector.shape_cast %297 : vector<8xf32> to vector<8x1xf32>
    %cst_134 = arith.constant 3.200000e+01 : f32
    %299 = vector.broadcast %cst_134 : f32 to vector<8x1xf32>
    %300 = arith.divf %298, %299 : vector<8x1xf32>
    %301 = vector.broadcast %293 : vector<8x1xf32> to vector<8x32xf32>
    %302 = arith.subf %285, %301 : vector<8x32xf32>
    %cst_135 = arith.constant 9.99999974E-6 : f32
    %303 = vector.broadcast %cst_135 : f32 to vector<8x1xf32>
    %304 = arith.addf %300, %303 : vector<8x1xf32>
    %305 = math.rsqrt %304 : vector<8x1xf32>
    %306 = vector.broadcast %305 : vector<8x1xf32> to vector<8x32xf32>
    %307 = arith.mulf %302, %306 : vector<8x32xf32>
    %308 = vector.broadcast %287 : vector<1x32xf32> to vector<8x32xf32>
    %309 = arith.mulf %307, %308 : vector<8x32xf32>
    %310 = vector.broadcast %289 : vector<1x32xf32> to vector<8x32xf32>
    %311 = arith.addf %309, %310 : vector<8x32xf32>
    %c0_136 = arith.constant 0 : index
    %c0_137 = arith.constant 0 : index
    %312 = vector.load %arg24[%c0_136, %c0_137] : memref<8x32xf32, #tpu.memory_space<vmem>>, vector<8x32xf32>
    tpu.vector_store %arg24[%c0_136, %c0_137], %311 {strides = array<i32>} : memref<8x32xf32, #tpu.memory_space<vmem>>, vector<8x32xf32>,
    %c1_i32 = arith.constant 1 : i32
    %313 = arith.cmpi eq, %arg1, %c1_i32 : i32
    %314 = arith.extui %313 : i1 to i32
    %c0_i32_138 = arith.constant 0 : i32
    %315 = arith.cmpi ne, %314, %c0_i32_138 : i32
    scf.if %315 {
      %c0_139 = arith.constant 0 : index
      %c0_140 = arith.constant 0 : index
      %c0_141 = arith.constant 0 : index
      %316 = vector.load %arg23[%c0_139, %c0_140, %c0_141] : memref<1x8x32xf32, #tpu.memory_space<vmem>>, vector<1x8x32xf32>
      %317 = vector.shape_cast %316 : vector<1x8x32xf32> to vector<8x32xf32>
      %318 = vector.shape_cast %311 : vector<8x32xf32> to vector<1x8x32xf32>
      tpu.vector_store %arg23[%c0_139, %c0_140, %c0_141], %318 {strides = array<i32>} : memref<1x8x32xf32, #tpu.memory_space<vmem>>, vector<1x8x32xf32>,
    } else {
    }
    return
  }
  func.func @transform_0(%arg0: i32, %arg1: i32) -> (i32, i32, i32) {
    %c0_i32 = arith.constant 0 : i32
    %c0_i32_0 = arith.constant 0 : i32
    %c0_i32_1 = arith.constant 0 : i32
    return %arg0, %c0_i32, %c0_i32_0 : i32, i32, i32
  }
  func.func @transform_1(%arg0: i32, %arg1: i32) -> (i32, i32, i32) {
    %c0_i32 = arith.constant 0 : i32
    %c0_i32_0 = arith.constant 0 : i32
    %c0_i32_1 = arith.constant 0 : i32
    return %arg1, %c0_i32, %c0_i32_0 : i32, i32, i32
  }
  func.func @transform_2(%arg0: i32, %arg1: i32) -> (i32, i32, i32) {
    %c0_i32 = arith.constant 0 : i32
    %c0_i32_0 = arith.constant 0 : i32
    %c0_i32_1 = arith.constant 0 : i32
    return %arg1, %c0_i32, %c0_i32_0 : i32, i32, i32
  }
  func.func @transform_3(%arg0: i32, %arg1: i32) -> (i32, i32, i32) {
    %c0_i32 = arith.constant 0 : i32
    %c0_i32_0 = arith.constant 0 : i32
    %c0_i32_1 = arith.constant 0 : i32
    return %arg1, %c0_i32, %c0_i32_0 : i32, i32, i32
  }
  func.func @transform_4(%arg0: i32, %arg1: i32) -> (i32, i32, i32) {
    %c0_i32 = arith.constant 0 : i32
    %c0_i32_0 = arith.constant 0 : i32
    %c0_i32_1 = arith.constant 0 : i32
    return %arg1, %c0_i32, %c0_i32_0 : i32, i32, i32
  }
  func.func @transform_5(%arg0: i32, %arg1: i32) -> (i32, i32, i32) {
    %c0_i32 = arith.constant 0 : i32
    %c0_i32_0 = arith.constant 0 : i32
    %c0_i32_1 = arith.constant 0 : i32
    return %arg1, %c0_i32, %c0_i32_0 : i32, i32, i32
  }
  func.func @transform_6(%arg0: i32, %arg1: i32) -> (i32, i32, i32) {
    %c0_i32 = arith.constant 0 : i32
    %c0_i32_0 = arith.constant 0 : i32
    %c0_i32_1 = arith.constant 0 : i32
    return %arg1, %c0_i32, %c0_i32_0 : i32, i32, i32
  }
  func.func @transform_7(%arg0: i32, %arg1: i32) -> (i32, i32, i32) {
    %c0_i32 = arith.constant 0 : i32
    %c0_i32_0 = arith.constant 0 : i32
    %c0_i32_1 = arith.constant 0 : i32
    return %arg1, %c0_i32, %c0_i32_0 : i32, i32, i32
  }
  func.func @transform_8(%arg0: i32, %arg1: i32) -> (i32, i32, i32) {
    %c0_i32 = arith.constant 0 : i32
    %c0_i32_0 = arith.constant 0 : i32
    %c0_i32_1 = arith.constant 0 : i32
    return %arg1, %c0_i32, %c0_i32_0 : i32, i32, i32
  }
  func.func @transform_9(%arg0: i32, %arg1: i32) -> (i32, i32, i32) {
    %c0_i32 = arith.constant 0 : i32
    %c0_i32_0 = arith.constant 0 : i32
    %c0_i32_1 = arith.constant 0 : i32
    return %arg1, %c0_i32, %c0_i32_0 : i32, i32, i32
  }
  func.func @transform_10(%arg0: i32, %arg1: i32) -> (i32, i32, i32) {
    %c0_i32 = arith.constant 0 : i32
    %c0_i32_0 = arith.constant 0 : i32
    %c0_i32_1 = arith.constant 0 : i32
    return %arg1, %c0_i32, %c0_i32_0 : i32, i32, i32
  }
  func.func @transform_11(%arg0: i32, %arg1: i32) -> (i32, i32, i32) {
    %c0_i32 = arith.constant 0 : i32
    %c0_i32_0 = arith.constant 0 : i32
    %c0_i32_1 = arith.constant 0 : i32
    return %arg1, %c0_i32, %c0_i32_0 : i32, i32, i32
  }
  func.func @transform_12(%arg0: i32, %arg1: i32) -> (i32, i32, i32) {
    %c0_i32 = arith.constant 0 : i32
    %c0_i32_0 = arith.constant 0 : i32
    %c0_i32_1 = arith.constant 0 : i32
    return %arg1, %c0_i32, %c0_i32_0 : i32, i32, i32
  }
  func.func @transform_13(%arg0: i32, %arg1: i32) -> (i32, i32, i32) {
    %c0_i32 = arith.constant 0 : i32
    %c0_i32_0 = arith.constant 0 : i32
    %c0_i32_1 = arith.constant 0 : i32
    return %arg1, %c0_i32, %c0_i32_0 : i32, i32, i32
  }
  func.func @transform_14(%arg0: i32, %arg1: i32) -> (i32, i32, i32) {
    %c0_i32 = arith.constant 0 : i32
    %c0_i32_0 = arith.constant 0 : i32
    %c0_i32_1 = arith.constant 0 : i32
    return %arg1, %c0_i32, %c0_i32_0 : i32, i32, i32
  }
  func.func @transform_15(%arg0: i32, %arg1: i32) -> (i32, i32, i32) {
    %c0_i32 = arith.constant 0 : i32
    %c0_i32_0 = arith.constant 0 : i32
    %c0_i32_1 = arith.constant 0 : i32
    return %arg1, %c0_i32, %c0_i32_0 : i32, i32, i32
  }
  func.func @transform_16(%arg0: i32, %arg1: i32) -> (i32, i32, i32) {
    %c0_i32 = arith.constant 0 : i32
    %c0_i32_0 = arith.constant 0 : i32
    %c0_i32_1 = arith.constant 0 : i32
    return %arg1, %c0_i32, %c0_i32_0 : i32, i32, i32
  }
  func.func @transform_17(%arg0: i32, %arg1: i32) -> (i32, i32, i32) {
    %c0_i32 = arith.constant 0 : i32
    %c0_i32_0 = arith.constant 0 : i32
    %c0_i32_1 = arith.constant 0 : i32
    return %arg1, %c0_i32, %c0_i32_0 : i32, i32, i32
  }
  func.func @transform_18(%arg0: i32, %arg1: i32) -> (i32, i32, i32) {
    %c0_i32 = arith.constant 0 : i32
    %c0_i32_0 = arith.constant 0 : i32
    %c0_i32_1 = arith.constant 0 : i32
    return %arg1, %c0_i32, %c0_i32_0 : i32, i32, i32
  }
  func.func @transform_19(%arg0: i32, %arg1: i32) -> (i32, i32, i32) {
    %c0_i32 = arith.constant 0 : i32
    %c0_i32_0 = arith.constant 0 : i32
    %c0_i32_1 = arith.constant 0 : i32
    return %arg1, %c0_i32, %c0_i32_0 : i32, i32, i32
  }
  func.func @transform_20(%arg0: i32, %arg1: i32) -> (i32, i32, i32) {
    %c0_i32 = arith.constant 0 : i32
    %c0_i32_0 = arith.constant 0 : i32
    %c0_i32_1 = arith.constant 0 : i32
    return %arg1, %c0_i32, %c0_i32_0 : i32, i32, i32
  }
  func.func @transform_21(%arg0: i32, %arg1: i32) -> (i32, i32, i32) {
    %c0_i32 = arith.constant 0 : i32
    %c0_i32_0 = arith.constant 0 : i32
    %c0_i32_1 = arith.constant 0 : i32
    return %arg0, %c0_i32, %c0_i32_0 : i32, i32, i32
  }
}

</mosaic_0001>

<bundles_post_ra>
// kernel: simple_transformer_forward.3
= control target key start
LH: loop header
LB: loop body
LE: loop exit
PB: predicated region body
PF: predicated region fallthrough
CT: control target
= control target key end

     0   :  { %v111_v0 = vmov 0.0   ;;  %vm112_vm0 = vmmov 0   ;;  %vm41_vm1 = vcmask 261120   ;;  %s154_s1 = inlined_call_operand.vmem [shape: bf16[32,128], index: 1, kind: input, shape index: {}]   ;;  %s155_s0 = inlined_call_operand.vmem [shape: f32[16,32], index: 0, kind: input, shape index: {}]   ;;  %s156_s2 = inlined_call_operand.vmem [shape: f32[1,128], index: 2, kind: input, shape index: {}]   ;;  %s157_s3 = inlined_call_operand.vmem [shape: f32[16,128], index: 3, kind: output, shape index: {}]  }
   0x1   :  { %99 = vmatprep.subr.bf16.mxu0 %v111_v0  ;;  %v109_v1 = vld [vmem:[%s154_s1 + $0x8] sm:$0xff]   ;;  %103 = vmatprep.mubr.msk.bf16.mxu0 %vm112_vm0, %v111_v0  ;;  %v110_v2 = vld [vmem:[%s154_s1] sm:$0xff]  }
   0x2   :  { %100 = vmatpush3.bf16.msra.mxu0 %v109_v1  ;;  %v15_v3 = vld [vmem:[%s155_s0] sm:$0xff]  ;;  %v16_v4 = vld [vmem:[%s155_s0 + $0x8] sm:$0xff] }
   0x3   :  { %101 = vmatprep.subr.bf16.mxu0 %v111_v0  ;;  %v17_v5 = vpack.c.bf16 %v16_v4, %v15_v3  ;;  %v92_v6 = vld [vmem:[%s156_s2] ss:$0 sm:$0xff] }
   0x6   :  { %102 = vmatpush3.bf16.msra.mxu0 %v110_v2 }
   0x9   :  { %104 = vmatmul.mubr.msk.bf16.vlgmr.msra.gmra.mxu0 %vm41_vm1, %v17_v5 }
  0xc9   :  { %v79_v7 = vpop.f32.mrf.mxu0 }
  0xca   :  { %v80_v8 = vadd.f32 %v92_v6, %v79_v7 }
  0xcb   :  { %v105_v9 = vpop.f32.mrf.mxu0 }
  0xcc   :  { %86 = vst [vmem:[%s157_s3] sm:$0xff] %v80_v8 }
  0xcd   :  { %v82_v10 = vpop.f32.mrf.mxu0 }
  0xce   :  { %v83_v11 = vadd.f32 %v92_v6, %v82_v10 }
  0xcf   :  { %v106_v12 = vpop.f32.mrf.mxu0 }
  0xd0   :  { %87 = vst [vmem:[%s157_s3 + $0x8] sm:$0xff] %v83_v11 }

// kernel: simple_transformer_forward.2
= control target key start
LH: loop header
LB: loop body
LE: loop exit
PB: predicated region body
PF: predicated region fallthrough
CT: control target
= control target key end

     0   :  { %s3338_s25 = smov 0   ;;  %s3340_s26 = smov 0   ;;  %s3777_s0 = inlined_call_operand.vmem [shape: f32[2,8,32], index: 0, kind: input, shape index: {}]   ;;  %s3778_s1 = inlined_call_operand.vmem [shape: bf16[2,32,96], index: 1, kind: input, shape index: {}]   ;;  %s3779_s2 = inlined_call_operand.vmem [shape: f32[2,1,96], index: 2, kind: input, shape index: {}]   ;;  %s3780_s3 = inlined_call_operand.vmem [shape: bf16[2,32,32], index: 3, kind: input, shape index: {}]   ;;  %s3781_s4 = inlined_call_operand.vmem [shape: f32[2,1,32], index: 4, kind: input, shape index: {}]   ;;  %s3782_s5 = inlined_call_operand.vmem [shape: bf16[2,32,32], index: 5, kind: input, shape index: {}]   ;;  %s3783_s6 = inlined_call_operand.vmem [shape: f32[2,1,32], index: 6, kind: input, shape index: {}]   ;;  %s3784_s7 = inlined_call_operand.vmem [shape: bf16[2,32,64], index: 7, kind: input, shape index: {}]   ;;  %s3785_s8 = inlined_call_operand.vmem [shape: f32[2,1,64], index: 8, kind: input, shape index: {}]   ;;  %s3786_s9 = inlined_call_operand.vmem [shape: bf16[2,32,32], index: 9, kind: input, shape index: {}]   ;;  %s3787_s10 = inlined_call_operand.vmem [shape: f32[2,1,32], index: 10, kind: input, shape index: {}]   ;;  %s3788_s11 = inlined_call_operand.vmem [shape: bf16[2,32,64], index: 11, kind: input, shape index: {}]   ;;  %s3789_s12 = inlined_call_operand.vmem [shape: f32[2,1,64], index: 12, kind: input, shape index: {}]   ;;  %s3790_s13 = inlined_call_operand.vmem [shape: bf16[2,64,32], index: 13, kind: input, shape index: {}]   ;;  %s3791_s14 = inlined_call_operand.vmem [shape: f32[2,1,32], index: 14, kind: input, shape index: {}]   ;;  %s3792_s15 = inlined_call_operand.vmem [shape: f32[2,1,32], index: 15, kind: input, shape index: {}]   ;;  %s3793_s16 = inlined_call_operand.vmem [shape: f32[2,1,32], index: 16, kind: input, shape index: {}]   ;;  %s3794_s17 = inlined_call_operand.vmem [shape: f32[2,1,32], index: 17, kind: input, shape index: {}]   ;;  %s3795_s18 = inlined_call_operand.vmem [shape: f32[2,1,32], index: 18, kind: input, shape index: {}]   ;;  %s3796_s19 = inlined_call_operand.vmem [shape: f32[2,1,32], index: 19, kind: input, shape index: {}]   ;;  %s3797_s20 = inlined_call_operand.vmem [shape: f32[2,1,32], index: 20, kind: input, shape index: {}]   ;;  %s3798_s21 = inlined_call_operand.vmem [shape: f32[2,8,32], index: 21, kind: output, shape index: {}]  }
   0x1   :  { %3806 = sst [smem:[#allocation14_spill]] %s3777_s0  ;;  %s3342_s27 = smov 0  }
   0x2   :  { %3807 = sst [smem:[#allocation15_spill]] %s3778_s1 }
   0x3   :  { %3808 = sst [smem:[#allocation16_spill]] %s3779_s2  ;;  %s3336_s2 = smov 0  }
   0x4   :  { %3809 = sst [smem:[#allocation17_spill]] %s3780_s3  ;;  %s3344_s3 = smov 0  }
   0x5   :  { %3810 = sst [smem:[#allocation18_spill]] %s3781_s4 }
   0x6   :  { %3811 = sst [smem:[#allocation19_spill]] %s3782_s5 }
   0x7   :  { %3812 = sst [smem:[#allocation20_spill]] %s3783_s6 }
   0x8   :  { %3813 = sst [smem:[#allocation21_spill]] %s3784_s7 }
   0x9   :  { %3814 = sst [smem:[#allocation22_spill]] %s3786_s9 }
   0xa   :  { %3815 = sst [smem:[#allocation23_spill]] %s3788_s11 }
   0xb   :  { %3816 = sst [smem:[#allocation24_spill]] %s3789_s12 }
   0xc   :  { %3817 = sst [smem:[#allocation25_spill]] %s3790_s13 }
   0xd   :  { %3818 = sst [smem:[#allocation26_spill]] %s3791_s14 }
   0xe   :  { %3819 = sst [smem:[#allocation27_spill]] %s3795_s18 }
   0xf   :  { %3820 = sst [smem:[#allocation28_spill]] %s3796_s19 }
  0x10   :  { %3821 = sst [smem:[#allocation29_spill]] %s3797_s20 }
  0x11   :  { %3822 = sst [smem:[#allocation30_spill]] %s3798_s21 }
  0x12 LB: > { %3823 = sst [smem:[#allocation4_spill]] %s3192_s2  ;;  %s40_s28 = sadd.s32 1, %s3200_s26  ;;  %s3208_s3 = sphi %s3344_s3, %s31_s3   ;;  %s3204_s27 = sphi %s3342_s27, %s3878_s27   ;;  %s3200_s26 = sphi %s3340_s26, %s3877_s26   ;;  %s3196_s25 = sphi %s3338_s25, %s3876_s25   ;;  %s3192_s2 = sphi %s3336_s2, %s3875_s2  }
  0x13   : > { %3824 = sst [smem:[#allocation5_spill]] %s3200_s26  ;;  %s43_s29 = sadd.s32 1, %s3204_s27 }
  0x14   : > { %3825 = sst [smem:[#allocation6_spill]] %s3204_s27  ;;  %p41_p0 = scmp.ge.s32.totalorder %s40_s28, 2 }
  0x15   : > { %3826 = sst [smem:[#allocation7_spill]] %s3208_s3  ;;  %p2769_p1 = scmp.ge.s32.totalorder %s3208_s3, 1 }
  0x16   : > { %p772_p2 = scmp.lt.s32.totalorder %s3208_s3, 5  ;;  %s3880_s28 = smov (%p41_p0, %s40_s28), 0 }
  0x17   : > { %3827 = sst [smem:[#allocation8_spill]] %s3880_s28  ;;  %s3882_s29 = smov (!%p41_p0, %s43_s29), %s3204_s27 }
  0x18   : > { %p773_p3 = pnand %p2769_p1, %p772_p2  ;;  %p45_p4 = scmp.ge.s32.totalorder %s3882_s29, 2 }
  0x1a   : > { %s3884_s29 = smov (%p45_p4, %s3882_s29), 0  ;;  %776 = sbr.rel (%p773_p3) target bundleno = 4164 (0x1044), region = 104 }
  0x1b   : > { %3828 = sst [smem:[#allocation9_spill]] %s3884_s29 }
  0x1f   : > { %p904_p5 = scmp.lt.s32.totalorder %s3196_s25, 1  ;;  %p908_p6 = scmp.lt.s32.totalorder %s3192_s2, 1 }
  0x20   : > { %s3829_s22 = sld [smem:[#allocation14_spill]] }
  0x21   : > { %s3886_s25 = smov (!%p904_p5, %s3196_s25), 1  ;;  %s3831_s28 = sld [smem:[#allocation15_spill]] }
  0x22   : > { %s3370_s0 = scalar_select %p908_p6, %s3192_s2, 1 }
  0x23   : > { %s2770_s4 = sshll.u32 %s3886_s25, 3  ;;  %s3834_s19 = sld [smem:[#allocation17_spill]] }
  0x24   : > { %s2842_s1 = sshll.u32 %s3370_s0, 4  ;;  %s3838_s7 = sld [smem:[#allocation21_spill]] }
  0x25   : > { %s3839_s9 = sld [smem:[#allocation22_spill]]  ;;  %s2848_s21 = sshll.u32 %s3370_s0, 5 }
  0x26   : > { %s3375_s23 = scalar_lea.vmem %s3829_s22, %s2770_s4  ;;  %s3841_s11 = sld [smem:[#allocation23_spill]] }
  0x27   : > { %3830 = sst [smem:[#allocation10_spill]] %s3375_s23  ;;  %s3381_s27 = scalar_lea.vmem %s3831_s28, %s2842_s1 }
  0x28   : > { %3832 = sst [smem:[#allocation11_spill]] %s3381_s27 }
  0x29   : > { %s3390_s30 = scalar_lea.vmem %s3834_s19, %s2842_s1  ;;  %s3836_s28 = sld [smem:[#allocation19_spill]] }
  0x2a   : > { %s3408_s19 = scalar_lea.vmem %s3838_s7, %s2842_s1  ;;  %s3844_s13 = sld [smem:[#allocation25_spill]] }
  0x2b   : > { %s3417_s29 = scalar_lea.vmem %s3839_s9, %s2842_s1  ;;  %s972_s7 = scalar_lea.vmem %s3794_s17, %s3370_s0 }
  0x2c   : > { %3840 = sst [smem:[#allocation12_spill]] %s3417_s29  ;;  %s3426_s6 = scalar_lea.vmem %s3841_s11, %s2842_s1 }
  0x2d   : > { %s3846_s5 = sld [smem:[#allocation27_spill]] }
  0x2e   : > { %s3848_s24 = sld [smem:[#allocation29_spill]] }
  0x2f   : > { %s3399_s27 = scalar_lea.vmem %s3836_s28, %s2842_s1  ;;  %s3849_s1 = sld [smem:[#allocation30_spill]] }
  0x30   : > { %s3440_s29 = scalar_lea.vmem %s3844_s13, %s2848_s21  ;;  %s3847_s21 = sld [smem:[#allocation28_spill]] }
  0x31   : > { %3845 = sst [smem:[#allocation13_spill]] %s3440_s29 }
  0x32   : > { %s3850_s26 = sld [smem:[#allocation4_spill]] }
  0x33   : > { %s975_s18 = scalar_lea.vmem %s3846_s5, %s3370_s0 }
  0x34   : > { %s981_s28 = scalar_lea.vmem %s3848_s24, %s3370_s0 }
  0x35   : > { %s3469_s3 = scalar_lea.vmem %s3849_s1, %s2770_s4 }
  0x36   : > { %s978_s22 = scalar_lea.vmem %s3847_s21, %s3370_s0 }
  0x38   : > { %p2786_p7 = scmp.ne.s32.totalorder %s3850_s26, 0 }
  0x39   : > { %s3851_s20 = sld [smem:[#allocation10_spill]] (!%p2786_p7) }
  0x3a   : > { %990 = sbr.rel (%p2786_p7) target bundleno = 65 (0x41), region = 108 }
  0x3f   : > { %v991_v0 = vld [vmem:[%s3851_s20] sm:$0xff]  ;;  %vm992_vm0 = vcmask 261120  }
  0x40   : > { %993 = vst.msk [vmem:[#allocation2] sm:$0xff] %vm992_vm0, %v991_v0 }
  0x41 PF: > { %s3852_s11 = sld [smem:[#allocation11_spill]]  ;;  %v3210_v2 = vmov 0.0   ;;  %vm3211_vm1 = vmmov 0   ;;  %vm1020_vm2 = vcmask 261120   ;;  %s3212_s29 = smov 120   ;;  %vm1073_vm3 = vcmask 64512  }
  0x42   : > { %2904 = vmatprep.subr.bf16.mxu1 %v3210_v2  ;;  %2918 = vmatprep.subr.bf16.mxu0 %v3210_v2  ;;  %s3853_s14 = sld [smem:[#allocation16_spill]]  ;;  %s3213_s26 = smov 96   ;;  %vm1137_vm4 = vcmask 1043456   ;;  %vm1296_vm5 = vcmask 130112   ;;  %vm1412_vm6 = vcmask 195712   ;;  %vm1528_vm7 = vcmask 261312  }
  0x43   : > { %2908 = vmatprep.mubr.msk.bf16.mxu1 %vm3211_vm1, %v3210_v2  ;;  %2920 = vmatprep.mubr.msk.bf16.mxu0 %vm3211_vm1, %v3210_v2  ;;  %s3214_s2 = smov 80   ;;  %s3215_s25 = smov 88   ;;  %vm2420_vm8 = vcmask 523264  }
  0x44   : > { %s3216_s23 = smov 72   ;;  %s3217_s5 = smov 112  }
  0x45   : > { %s3218_s9 = smov 104   ;;  %s3219_s21 = smov 56  }
  0x46   : > { %s3220_s24 = smov 64   ;;  %s3221_s1 = smov 40  }
  0x47   : > { %v3116_v1 = vld [vmem:[%s3852_s11 + $0x8] sm:$0xff]   ;;  %v3117_v3 = vld [vmem:[%s3852_s11] sm:$0xff]   ;;  %s3222_s20 = smov 48   ;;  %s3223_s11 = smov 8  }
  0x48   : > { %2905 = vmatpush3.bf16.msra.mxu1 %v3116_v1  ;;  %v3479_v4 = vld [vmem:[#allocation2] sm:$0xff]  ;;  %s3854_s4 = scalar_lea.vmem %s3853_s14, %s3370_s0  ;;  %s3224_s12 = smov 16  }
  0x49   : > { %2906 = vmatprep.subr.bf16.mxu1 %v3210_v2  ;;  %v996_v5 = vpack.c.bf16 %v3479_v4, %v3479_v4  ;;  %v2787_v6 = vld [vmem:[%s3854_s4] ss:$0 sm:$0xff]  ;;  %s3225_s13 = smov 24   ;;  %s3855_s4 = sld [smem:[#allocation18_spill]] }
  0x4a   : > { %s3867_s14 = sld [smem:[#allocation24_spill]] }
  0x4c   : > { %2907 = vmatpush3.bf16.msra.mxu1 %v3117_v3 }
  0x4d   : > { %2912 = vmatprep.subr.bf16.mxu1 %v3210_v2 }
  0x4f   : > { %2909 = vmatmul.mubr.msk.bf16.vlgmr.msra.gmra.mxu1 %vm1020_vm2, %v996_v5 }
  0x50   : > { %2914 = vmatprep.mubr.msk.bf16.mxu1 %vm3211_vm1, %v3210_v2 }
 0x10f   : > { %v1058_v7 = vpop.f32.mrf.mxu1 }
 0x110   : > { %v1059_v8 = vadd.f32 %v2787_v6, %v1058_v7 }
 0x111   : > { %v2910_v9 = vpop.f32.mrf.mxu1 }
 0x112   : > { %v3495_v10 = vpack.c.bf16 %v1059_v8, %v1059_v8 }
 0x113   : > { %v1061_v11 = vpop.f32.mrf.mxu1 }
 0x114   : > { %1182 = vrot.lane.b32.xlu1 %v3495_v10, %s3212_s29  ;;  %1071 = vrot.lane.b32.xlu0 %v3495_v10, %s3213_s26 }
 0x115   : > { %v2911_v12 = vpop.f32.mrf.mxu1 }
 0x118   : > { %1300 = vrot.lane.b32.xlu1 %v3495_v10, %s3214_s2  ;;  %1184 = vrot.lane.b32.xlu0 %v3495_v10, %s3215_s25 }
 0x11c   : > { %1416 = vrot.lane.b32.xlu1 %v3495_v10, %s3216_s23  ;;  %1298 = vrot.lane.b32.xlu0 %v3495_v10, %s3217_s5 }
 0x120   : > { %1414 = vrot.lane.b32.xlu0 %v3495_v10, %s3218_s9 }
 0x186   : > { %v1072_v13 = vpop.permute.xlu0 %1071  ;;  %v1183_v16 = vpop.permute.xlu1 %1182 }
 0x187   : > { %v1078_v14 = vsel %vm1073_vm3, %v1072_v13, 0 }
 0x188   : > { %2913 = vmatpush3.bf16.xpose.msra.mxu1 %v1078_v14 }
 0x189   : > { %2924 = vmatprep.subr.bf16.mxu1 %v3210_v2 }
 0x18a   : > { %v1185_v15 = vpop.permute.xlu0 %1184  ;;  %v1301_v18 = vpop.permute.xlu1 %1300 }
 0x18b   : > { %v1190_v17 = vsel %vm1073_vm3, %v1185_v15, 0  ;;  %v1306_v19 = vsel %vm1073_vm3, %v1301_v18, 0 }
 0x18e   : > { %v1417_v20 = vpop.permute.xlu1 %1416  ;;  %v1299_v21 = vpop.permute.xlu0 %1298 }
 0x18f   : > { %2915 = vmatmul.mubr.msk.bf16.vlgmr.msra.gmra.mxu1 %vm1073_vm3, %v3495_v10  ;;  %v1422_v22 = vsel %vm1073_vm3, %v1417_v20, 0 }
 0x190   : > { %2925 = vmatpush3.bf16.xpose.msra.mxu1 %v1190_v17  ;;  %2926 = vmatprep.mubr.msk.bf16.mxu1 %vm3211_vm1, %v3210_v2 }
 0x191   : > { %2936 = vmatprep.subr.bf16.mxu1 %v3210_v2 }
 0x192   : > { %v1415_v23 = vpop.permute.xlu0 %1414 }
 0x197   : > { %2927 = vmatmul.mubr.msk.bf16.vlgmr.msra.gmra.mxu1 %vm1073_vm3, %v1183_v16 }
 0x198   : > { %2937 = vmatpush3.bf16.xpose.msra.mxu1 %v1306_v19  ;;  %2938 = vmatprep.mubr.msk.bf16.mxu1 %vm3211_vm1, %v3210_v2 }
 0x199   : > { %2948 = vmatprep.subr.bf16.mxu1 %v3210_v2 }
 0x19f   : > { %2939 = vmatmul.mubr.msk.bf16.vlgmr.msra.gmra.mxu1 %vm1073_vm3, %v1299_v21 }
 0x1a0   : > { %2949 = vmatpush3.bf16.xpose.msra.mxu1 %v1422_v22  ;;  %2950 = vmatprep.mubr.msk.bf16.mxu1 %vm3211_vm1, %v3210_v2 }
 0x1a1   : > { %2960 = vmatprep.subr.bf16.mxu1 %v3210_v2 }
 0x1a7   : > { %2951 = vmatmul.mubr.msk.bf16.vlgmr.msra.gmra.mxu1 %vm1073_vm3, %v1415_v23 }
 0x1a8   : > { %2964 = vmatprep.mubr.msk.bf16.mxu1 %vm3211_vm1, %v3210_v2 }
 0x24f   : > { %v1114_v24 = vpop.f32.mrf.mxu1 }
 0x250   : > { %v1120_v25 = vsel %vm1073_vm3, %v1114_v24, -inf }
 0x251   : > { %1121 = vmax.xlane.f32.xlu1 %v1120_v25  ;;  %v2916_v26 = vpop.f32.mrf.mxu1 }
 0x253   : > { %v1117_v27 = vpop.f32.mrf.mxu1 }
 0x255   : > { %v2917_v28 = vpop.f32.mrf.mxu1 }
 0x257   : > { %v1226_v29 = vpop.f32.mrf.mxu1 }
 0x258   : > { %v1232_v30 = vsel %vm1073_vm3, %v1226_v29, -inf }
 0x259   : > { %1233 = vmax.xlane.f32.xlu0 %v1232_v30  ;;  %v2928_v31 = vpop.f32.mrf.mxu1 }
 0x25b   : > { %v1229_v32 = vpop.f32.mrf.mxu1 }
 0x25d   : > { %v2929_v33 = vpop.f32.mrf.mxu1 }
 0x25f   : > { %v1342_v34 = vpop.f32.mrf.mxu1 }
 0x260   : > { %v1348_v35 = vsel %vm1073_vm3, %v1342_v34, -inf }
 0x261   : > { %1349 = vmax.xlane.f32.xlu0 %v1348_v35  ;;  %v2940_v36 = vpop.f32.mrf.mxu1 }
 0x262   : > { %v3119_v36 = vld [vmem:[%s3390_s30] sm:$0xff]  }
 0x263   : > { %v1345_v37 = vpop.f32.mrf.mxu1 }
 0x265   : > { %v2941_v38 = vpop.f32.mrf.mxu1 }
 0x267   : > { %v1458_v39 = vpop.f32.mrf.mxu1 }
 0x268   : > { %v1464_v40 = vsel %vm1073_vm3, %v1458_v39, -inf }
 0x269   : > { %1465 = vmax.xlane.f32.xlu1 %v1464_v40  ;;  %v2952_v41 = vpop.f32.mrf.mxu1 }
 0x26b   : > { %v1461_v42 = vpop.f32.mrf.mxu1 }
 0x26d   : > { %v2953_v43 = vpop.f32.mrf.mxu1 }
 0x2da   : > { %v1122_v44 = vpop.xlane.xlu1 %1121 }
 0x2db   : > { %v1123_v45 = vsub.f32 %v1114_v24, %v1122_v44 }
 0x2dd   : > { %v1124_v46 = vmul.f32 1.442695, %v1123_v45 }
 0x2df   : > { %3132 = vpow2.f32 %v1124_v46 }
 0x2e2   : > { %v1234_v47 = vpop.xlane.xlu0 %1233 }
 0x2e3   : > { %v1235_v48 = vsub.f32 %v1226_v29, %v1234_v47 }
 0x2e5   : > { %v1236_v49 = vmul.f32 1.442695, %v1235_v48 }
 0x2e7   : > { %3134 = vpow2.f32 %v1236_v49 }
 0x2ea   : > { %v1350_v50 = vpop.xlane.xlu0 %1349 }
 0x2eb   : > { %v1351_v51 = vsub.f32 %v1342_v34, %v1350_v50  ;;  %v3118_v34 = vld [vmem:[%s3390_s30 + $0x8] sm:$0xff]  }
 0x2ec   : > { %v3133_v52 = vpop.eup %3132  ;;  %2961 = vmatpush3.bf16.msra.mxu1 %v3118_v34 }
 0x2ed   : > { %v1352_v53 = vmul.f32 1.442695, %v1351_v51  ;;  %v1126_v54 = vsel %vm1073_vm3, %v3133_v52, 0.0  ;;  %2962 = vmatprep.subr.bf16.mxu1 %v3210_v2 }
 0x2ee   : > { %1127 = vadd.xlane.f32.xlu0 %v1126_v54 }
 0x2ef   : > { %3136 = vpow2.f32 %v1352_v53 }
 0x2f0   : > { %2963 = vmatpush3.bf16.msra.mxu1 %v3119_v36 }
 0x2f1   : > { %2976 = vmatprep.subr.bf16.mxu1 %v3210_v2 }
 0x2f2   : > { %v1466_v59 = vpop.xlane.xlu1 %1465 }
 0x2f3   : > { %v1467_v60 = vsub.f32 %v1458_v39, %v1466_v59 }
 0x2f4   : > { %v3135_v55 = vpop.eup %3134 }
 0x2f5   : > { %v1238_v56 = vsel %vm1073_vm3, %v3135_v55, 0.0  ;;  %v1468_v61 = vmul.f32 1.442695, %v1467_v60 }
 0x2f6   : > { %1239 = vadd.xlane.f32.xlu1 %v1238_v56 }
 0x2f7   : > { %3138 = vpow2.f32 %v1468_v61 }
 0x2fc   : > { %v3137_v57 = vpop.eup %3136 }
 0x2fd   : > { %v1354_v58 = vsel %vm1073_vm3, %v3137_v57, 0.0 }
 0x2fe   : > { %1355 = vadd.xlane.f32.xlu0 %v1354_v58 }
 0x304   : > { %v3139_v62 = vpop.eup %3138 }
 0x305   : > { %v1470_v63 = vsel %vm1073_vm3, %v3139_v62, 0.0 }
 0x307   : > { %1244 = vrot.lane.b32.xlu1 %v3495_v10, %s3219_s21  ;;  %s3856_s21 = scalar_lea.vmem %s3855_s4, %s3370_s0 }
 0x308   : > { %v2799_v49 = vld [vmem:[%s3856_s21] ss:$0 sm:$0xff]  ;;  %s3869_s21 = sld [smem:[#allocation26_spill]] }
 0x314   : > { %1132 = vrot.lane.b32.xlu0 %v3495_v10, %s3220_s24  ;;  %s3857_s24 = sld [smem:[#allocation10_spill]] }
 0x318   : > { %1476 = vrot.lane.b32.xlu0 %v3495_v10, %s3221_s1 }
 0x32b   : > { %1471 = vadd.xlane.f32.xlu1 %v1470_v63  ;;  %v995_v63 = vld [vmem:[%s3857_s24] sm:$0xff]  ;;  %s3860_s24 = scalar_lea.vmem %s3785_s8, %s3370_s0 }
 0x33c   : > { %1360 = vrot.lane.b32.xlu1 %v3495_v10, %s3222_s20  ;;  %s3858_s20 = scalar_lea.vmem %s3792_s15, %s3370_s0 }
 0x377   : > { %v1128_v0 = vpop.xlane.xlu0 %1127 }
 0x378   : > { %3140 = vrcp.f32 %v1128_v0  ;;  %v1691_v0 = vpack.c.bf16 %v995_v63, %v995_v63 }
 0x37f   : > { %v1240_v1 = vpop.xlane.xlu1 %1239 }
 0x380   : > { %3142 = vrcp.f32 %v1240_v1  ;;  %v3122_v1 = vld [vmem:[%s3399_s27 + $0x8] sm:$0xff]  }
 0x383   : > { %v1245_v9 = vpop.permute.xlu1 %1244 }
 0x384   : > { %v1250_v13 = vsel %vm1137_vm4, %v1245_v9, 0  ;;  %v2803_v9 = vld [vmem:[%s3858_s20] ss:$0 sm:$0xff]  ;;  %s3861_s20 = sld [smem:[#allocation20_spill]] }
 0x385   : > { %v3141_v3 = vpop.eup %3140 }
 0x386   : > { %v1130_v6 = vmul.f32 %v3141_v3, %v3133_v52  ;;  %v3123_v3 = vld [vmem:[%s3399_s27] sm:$0xff]   ;;  %s3859_s27 = scalar_lea.vmem %s3793_s16, %s3370_s0 }
 0x387   : > { %v1356_v5 = vpop.xlane.xlu0 %1355 }
 0x388   : > { %v1131_v11 = vpack.c.bf16 %v1130_v6, %v1130_v6  ;;  %3144 = vrcp.f32 %v1356_v5 }
 0x38a   : > { %s3862_s30 = scalar_lea.vmem %s3861_s20, %s3370_s0 }
 0x38b   : > { %v1133_v7 = vpop.permute.xlu0 %1132 }
 0x38c   : > { %v1139_v8 = vsel %vm1137_vm4, %v1133_v7, 0 }
 0x38d   : > { %2919 = vmatpush3.bf16.msra.mxu0 %v1139_v8  ;;  %v3143_v12 = vpop.eup %3142 }
 0x38e   : > { %2930 = vmatprep.subr.bf16.mxu0 %v3210_v2  ;;  %v1242_v10 = vmul.f32 %v3143_v12, %v3135_v55  ;;  %v2804_v12 = vld [vmem:[%s3859_s27] ss:$0 sm:$0xff]  ;;  %s3868_s27 = scalar_lea.vmem %s3867_s14, %s3370_s0 }
 0x38f   : > { %v1477_v20 = vpop.permute.xlu0 %1476 }
 0x390   : > { %2921 = vmatmul.mubr.msk.bf16.vlgmr.msra.gmra.mxu0 %vm1073_vm3, %v1131_v11  ;;  %v1243_v14 = vpack.c.bf16 %v1242_v10, %v1242_v10  ;;  %v1482_v22 = vsel %vm1137_vm4, %v1477_v20, 0 }
 0x391   : > { %2931 = vmatpush3.bf16.msra.mxu0 %v1250_v13  ;;  %2932 = vmatprep.mubr.msk.bf16.mxu0 %vm3211_vm1, %v3210_v2 }
 0x392   : > { %2942 = vmatprep.subr.bf16.mxu0 %v3210_v2 }
 0x395   : > { %v3145_v15 = vpop.eup %3144 }
 0x396   : > { %v1358_v17 = vmul.f32 %v3145_v15, %v3137_v57  ;;  %v2809_v15 = vld [vmem:[%s3860_s24] ss:$0 sm:$0xff]  ;;  %s3870_s24 = scalar_lea.vmem %s3869_s21, %s3370_s0 }
 0x398   : > { %2933 = vmatmul.mubr.msk.bf16.vlgmr.msra.gmra.mxu0 %vm1073_vm3, %v1243_v14  ;;  %v1359_v21 = vpack.c.bf16 %v1358_v17, %v1358_v17 }
 0x399   : > { %2944 = vmatprep.mubr.msk.bf16.mxu0 %vm3211_vm1, %v3210_v2 }
 0x3b4   : > { %v1472_v16 = vpop.xlane.xlu1 %1471 }
 0x3b5   : > { %3146 = vrcp.f32 %v1472_v16 }
 0x3b8   : > { %v1361_v18 = vpop.permute.xlu1 %1360 }
 0x3b9   : > { %v1366_v19 = vsel %vm1137_vm4, %v1361_v18, 0 }
 0x3ba   : > { %2943 = vmatpush3.bf16.msra.mxu0 %v1366_v19 }
 0x3bb   : > { %2954 = vmatprep.subr.bf16.mxu0 %v3210_v2 }
 0x3bd   : > { %2945 = vmatmul.mubr.msk.bf16.vlgmr.msra.gmra.mxu0 %vm1073_vm3, %v1359_v21 }
 0x3be   : > { %2955 = vmatpush3.bf16.msra.mxu0 %v1482_v22  ;;  %2956 = vmatprep.mubr.msk.bf16.mxu0 %vm3211_vm1, %v3210_v2 }
 0x3bf   : > { %2968 = vmatprep.subr.bf16.mxu0 %v3210_v2 }
 0x3c2   : > { %v3147_v23 = vpop.eup %3146 }
 0x3c3   : > { %v1474_v24 = vmul.f32 %v3147_v23, %v3139_v62  ;;  %v3120_v62 = vld [vmem:[%s3408_s19 + $0x8] sm:$0xff]   ;;  %v2805_v23 = vld [vmem:[%s3862_s30] ss:$0 sm:$0xff] }
 0x3c5   : > { %v1475_v25 = vpack.c.bf16 %v1474_v24, %v1474_v24 }
 0x3c7   : > { %2957 = vmatmul.mubr.msk.bf16.vlgmr.msra.gmra.mxu0 %vm1073_vm3, %v1475_v25 }
 0x3c8   : > { %2972 = vmatprep.mubr.msk.bf16.mxu0 %vm3211_vm1, %v3210_v2  ;;  %2969 = vmatpush3.bf16.msra.mxu0 %v3122_v1 }
 0x3c9   : > { %2970 = vmatprep.subr.bf16.mxu0 %v3210_v2 }
 0x3cc   : > { %2971 = vmatpush3.bf16.msra.mxu0 %v3123_v3 }
 0x3cd   : > { %2984 = vmatprep.subr.bf16.mxu0 %v3210_v2 }
 0x450   : > { %v1175_v26 = vpop.f32.mrf.mxu0 }
 0x451   : > { %1181 = vst.msk [vmem:[#allocation3] sm:$0xff] %vm1073_vm3, %v1175_v26 }
 0x452   : > { %v2922_v27 = vpop.f32.mrf.mxu0 }
 0x454   : > { %v1178_v28 = vpop.f32.mrf.mxu0 }
 0x456   : > { %v2923_v29 = vpop.f32.mrf.mxu0 }
 0x458   : > { %v1286_v30 = vpop.f32.mrf.mxu0 }
 0x459   : > { %1293 = vrot.lane.b32.xlu1 %v1286_v30, %s3223_s11 }
 0x45a   : > { %v2934_v31 = vpop.f32.mrf.mxu0 }
 0x45c   : > { %v1289_v32 = vpop.f32.mrf.mxu0 }
 0x45e   : > { %v2935_v33 = vpop.f32.mrf.mxu0 }
 0x47d   : > { %v1402_v35 = vpop.f32.mrf.mxu0 }
 0x47e   : > { %1409 = vrot.lane.b32.xlu0 %v1402_v35, %s3224_s12 }
 0x47f   : > { %v2946_v37 = vpop.f32.mrf.mxu0 }
 0x481   : > { %v1405_v38 = vpop.f32.mrf.mxu0 }
 0x483   : > { %v2947_v39 = vpop.f32.mrf.mxu0 }
 0x487   : > { %v1518_v40 = vpop.f32.mrf.mxu0 }
 0x488   : > { %1525 = vrot.lane.b32.xlu1 %v1518_v40, %s3225_s13 }
 0x489   : > { %v2958_v41 = vpop.f32.mrf.mxu0 }
 0x48b   : > { %v1521_v42 = vpop.f32.mrf.mxu0 }
 0x48d   : > { %v2959_v43 = vpop.f32.mrf.mxu0 }
 0x4cb   : > { %v1294_v44 = vpop.permute.xlu1 %1293 }
 0x4cc   : > { %1297 = vst.msk [vmem:[#allocation3] sm:$0xff] %vm1296_vm5, %v1294_v44 }
 0x4f0   : > { %v1410_v45 = vpop.permute.xlu0 %1409 }
 0x4f1   : > { %1413 = vst.msk [vmem:[#allocation3] sm:$0xff] %vm1412_vm6, %v1410_v45 }
 0x4fa   : > { %v1526_v46 = vpop.permute.xlu1 %1525 }
 0x4fb   : > { %1529 = vst.msk [vmem:[#allocation3] sm:$0xff] %vm1528_vm7, %v1526_v46 }
 0x502   : > { %v1530_v47 = vld [vmem:[#allocation3] sm:$0xff] }
 0x503   : > { %v1531_v48 = vpack.c.bf16 %v1530_v47, %v1530_v47 }
 0x505   : > { %2965 = vmatmul.mubr.msk.bf16.vlgmr.msra.gmra.mxu1 %vm1020_vm2, %v1531_v48 }
 0x506   : > { %2980 = vmatprep.mubr.msk.bf16.mxu1 %vm3211_vm1, %v3210_v2  ;;  %2977 = vmatpush3.bf16.msra.mxu1 %v3120_v62 }
 0x507   : > { %2978 = vmatprep.subr.bf16.mxu1 %v3210_v2 }
 0x5c5   : > { %v1587_v50 = vpop.f32.mrf.mxu1 }
 0x5c6   : > { %v1588_v51 = vadd.f32 %v2799_v49, %v1587_v50 }
 0x5c7   : > { %v2966_v52 = vpop.f32.mrf.mxu1 }
 0x5c8   : > { %v1593_v53 = vadd.f32 %v1588_v51, %v3479_v4  ;;  %v3121_v4 = vld [vmem:[%s3408_s19] sm:$0xff]  }
 0x5c9   : > { %v1590_v54 = vpop.f32.mrf.mxu1  ;;  %2979 = vmatpush3.bf16.msra.mxu1 %v3121_v4 }
 0x5ca   : > { %v1596_v55 = vsel %vm1020_vm2, %v1593_v53, 0.0  ;;  %2990 = vmatprep.subr.bf16.mxu1 %v3210_v2 }
 0x5cb   : > { %1597 = vadd.xlane.f32.xlu0 %v1596_v55  ;;  %v2967_v56 = vpop.f32.mrf.mxu1 }
 0x5cc   : > { %2981 = vmatmul.mubr.msk.bf16.vlgmr.msra.gmra.mxu1 %vm1020_vm2, %v1691_v0 }
 0x5cd   : > { %2992 = vmatprep.mubr.msk.bf16.mxu1 %vm3211_vm1, %v3210_v2 }
 0x654   : > { %v1598_v57 = vpop.xlane.xlu0 %1597 }
 0x655   : > { %v1600_v58 = vmul.f32 0.03125, %v1598_v57 }
 0x657   : > { %v1601_v59 = vsub.f32 %v1593_v53, %v1600_v58 }
 0x659   : > { %v1602_v60 = vmul.f32 %v1601_v59, %v1601_v59 }
 0x65b   : > { %v1603_v61 = vsel %vm1020_vm2, %v1602_v60, 0.0 }
 0x65c   : > { %1604 = vadd.xlane.f32.xlu1 %v1603_v61 }
 0x68c   : > { %v1752_v16 = vpop.f32.mrf.mxu1 }
 0x68d   : > { %v1753_v17 = vadd.f32 %v2809_v15, %v1752_v16 }
 0x68e   : > { %v2982_v18 = vpop.f32.mrf.mxu1 }
 0x68f   : > { %v3620_v19 = vpack.c.bf16 %v1753_v17, %v1753_v17 }
 0x690   : > { %v1755_v20 = vpop.f32.mrf.mxu1 }
 0x691   : > { %1876 = vrot.lane.b32.xlu0 %v3620_v19, %s3212_s29  ;;  %v1769_v21 = vsel %vm1073_vm3, %v3620_v19, 0 }
 0x692   : > { %v2983_v22 = vpop.f32.mrf.mxu1 }
 0x695   : > { %1991 = vrot.lane.b32.xlu0 %v3620_v19, %s3217_s5 }
 0x699   : > { %2106 = vrot.lane.b32.xlu0 %v3620_v19, %s3218_s9 }
 0x6e5   : > { %v1605_v5 = vpop.xlane.xlu1 %1604 }
 0x6e6   : > { %v1606_v6 = vmul.f32 0.03125, %v1605_v5 }
 0x6e8   : > { %v1607_v7 = vadd.f32 1e-05, %v1606_v6 }
 0x6ea   : > { %3148 = vrsqrt.f32 %v1607_v7 }
 0x6f7   : > { %v3149_v8 = vpop.eup %3148 }
 0x6f8   : > { %v1609_v11 = vmul.f32 %v3149_v8, %v1601_v59 }
 0x6fa   : > { %v1616_v13 = vmul.f32 %v2803_v9, %v1609_v11 }
 0x6fc   : > { %v3608_v10 = vadd.f32 %v2804_v12, %v1616_v13 }
 0x6fe   : > { %v1624_v14 = vpack.c.bf16 %v3608_v10, %v3608_v10 }
 0x700   : > { %2973 = vmatmul.mubr.msk.bf16.vlgmr.msra.gmra.mxu0 %vm1020_vm2, %v1624_v14 }
 0x701   : > { %2986 = vmatprep.mubr.msk.bf16.mxu0 %vm3211_vm1, %v3210_v2  ;;  %2985 = vmatpush3.bf16.xpose.msra.mxu0 %v1769_v21 }
 0x702   : > { %2996 = vmatprep.subr.bf16.mxu0 %v3210_v2 }
 0x703   : > { %v1877_v27 = vpop.permute.xlu0 %1876 }
 0x704   : > { %v1882_v29 = vsel %vm1073_vm3, %v1877_v27, 0 }
 0x707   : > { %v1992_v32 = vpop.permute.xlu0 %1991 }
 0x708   : > { %v1997_v34 = vsel %vm1073_vm3, %v1992_v32, 0 }
 0x70b   : > { %v2107_v35 = vpop.permute.xlu0 %2106 }
 0x70c   : > { %v2112_v37 = vsel %vm1073_vm3, %v2107_v35, 0 }
 0x7c0   : > { %v1685_v24 = vpop.f32.mrf.mxu0 }
 0x7c1   : > { %v1686_v25 = vadd.f32 %v2805_v23, %v1685_v24 }
 0x7c2   : > { %v2974_v26 = vpop.f32.mrf.mxu0 }
 0x7c3   : > { %v1763_v28 = vpack.c.bf16 %v1686_v25, %v1686_v25 }
 0x7c4   : > { %v1688_v30 = vpop.f32.mrf.mxu0 }
 0x7c5   : > { %1874 = vrot.lane.b32.xlu1 %v1763_v28, %s3212_s29  ;;  %2987 = vmatmul.mubr.msk.bf16.vlgmr.msra.gmra.mxu0 %vm1073_vm3, %v1763_v28  ;;  %s3863_s29 = sld [smem:[#allocation12_spill]] }
 0x7c6   : > { %v2975_v31 = vpop.f32.mrf.mxu0  ;;  %2997 = vmatpush3.bf16.xpose.msra.mxu0 %v1882_v29  ;;  %2998 = vmatprep.mubr.msk.bf16.mxu0 %vm3211_vm1, %v3210_v2 }
 0x7c7   : > { %3008 = vmatprep.subr.bf16.mxu0 %v3210_v2 }
 0x7c9   : > { %1989 = vrot.lane.b32.xlu1 %v1763_v28, %s3217_s5 }
 0x7cd   : > { %2104 = vrot.lane.b32.xlu1 %v1763_v28, %s3218_s9 }
 0x837   : > { %v1875_v33 = vpop.permute.xlu1 %1874 }
 0x838   : > { %2999 = vmatmul.mubr.msk.bf16.vlgmr.msra.gmra.mxu0 %vm1073_vm3, %v1875_v33 }
 0x839   : > { %3009 = vmatpush3.bf16.xpose.msra.mxu0 %v1997_v34  ;;  %3010 = vmatprep.mubr.msk.bf16.mxu0 %vm3211_vm1, %v3210_v2 }
 0x83a   : > { %3020 = vmatprep.subr.bf16.mxu0 %v3210_v2 }
 0x83b   : > { %v1990_v36 = vpop.permute.xlu1 %1989 }
 0x83f   : > { %v2105_v38 = vpop.permute.xlu1 %2104 }
 0x840   : > { %3011 = vmatmul.mubr.msk.bf16.vlgmr.msra.gmra.mxu0 %vm1073_vm3, %v1990_v36 }
 0x841   : > { %3021 = vmatpush3.bf16.xpose.msra.mxu0 %v2112_v37  ;;  %3022 = vmatprep.mubr.msk.bf16.mxu0 %vm3211_vm1, %v3210_v2 }
 0x842   : > { %3032 = vmatprep.subr.bf16.mxu0 %v3210_v2 }
 0x848   : > { %3023 = vmatmul.mubr.msk.bf16.vlgmr.msra.gmra.mxu0 %vm1073_vm3, %v2105_v38 }
 0x849   : > { %3036 = vmatprep.mubr.msk.bf16.mxu0 %vm3211_vm1, %v3210_v2 }
 0x885   : > { %v1805_v39 = vpop.f32.mrf.mxu0 }
 0x886   : > { %v1811_v40 = vsel %vm1073_vm3, %v1805_v39, -inf }
 0x887   : > { %1812 = vmax.xlane.f32.xlu0 %v1811_v40  ;;  %v2988_v41 = vpop.f32.mrf.mxu0 }
 0x889   : > { %v1808_v42 = vpop.f32.mrf.mxu0 }
 0x88b   : > { %v2989_v43 = vpop.f32.mrf.mxu0 }
 0x8f8   : > { %v1918_v44 = vpop.f32.mrf.mxu0 }
 0x8f9   : > { %v1924_v45 = vsel %vm1073_vm3, %v1918_v44, -inf }
 0x8fa   : > { %1925 = vmax.xlane.f32.xlu1 %v1924_v45  ;;  %v3000_v46 = vpop.f32.mrf.mxu0 }
 0x8fc   : > { %v1921_v47 = vpop.f32.mrf.mxu0 }
 0x8fe   : > { %v3001_v48 = vpop.f32.mrf.mxu0 }
 0x8ff   : > { %v3124_v48 = vld [vmem:[%s3863_s29 + $0x8] sm:$0xff]  }
 0x900   : > { %v2033_v49 = vpop.f32.mrf.mxu0  ;;  %3033 = vmatpush3.bf16.msra.mxu0 %v3124_v48 }
 0x901   : > { %v2039_v50 = vsel %vm1073_vm3, %v2033_v49, -inf  ;;  %3034 = vmatprep.subr.bf16.mxu0 %v3210_v2 }
 0x902   : > { %2040 = vmax.xlane.f32.xlu0 %v2039_v50  ;;  %v3012_v51 = vpop.f32.mrf.mxu0  ;;  %v3125_v50 = vld [vmem:[%s3863_s29] sm:$0xff]  }
 0x904   : > { %v2036_v52 = vpop.f32.mrf.mxu0  ;;  %3035 = vmatpush3.bf16.msra.mxu0 %v3125_v50 }
 0x905   : > { %3048 = vmatprep.subr.bf16.mxu0 %v3210_v2 }
 0x906   : > { %v3013_v53 = vpop.f32.mrf.mxu0 }
 0x908   : > { %v2148_v54 = vpop.f32.mrf.mxu0 }
 0x909   : > { %v2154_v55 = vsel %vm1073_vm3, %v2148_v54, -inf }
 0x90a   : > { %2155 = vmax.xlane.f32.xlu0 %v2154_v55  ;;  %v3024_v56 = vpop.f32.mrf.mxu0 }
 0x90c   : > { %v2151_v57 = vpop.f32.mrf.mxu0 }
 0x90e   : > { %v3025_v58 = vpop.f32.mrf.mxu0 }
 0x910   : > { %v1813_v59 = vpop.xlane.xlu0 %1812 }
 0x911   : > { %v1814_v60 = vsub.f32 %v1805_v39, %v1813_v59 }
 0x913   : > { %v1815_v61 = vmul.f32 1.442695, %v1814_v60 }
 0x915   : > { %3150 = vpow2.f32 %v1815_v61 }
 0x922   : > { %v3151_v62 = vpop.eup %3150 }
 0x923   : > { %v1817_v4 = vsel %vm1073_vm3, %v3151_v62, 0.0 }
 0x924   : > { %1818 = vadd.xlane.f32.xlu1 %v1817_v4 }
 0x935   : > { %1824 = vrot.lane.b32.xlu1 %v3620_v19, %s3213_s26 }
 0x983   : > { %v1926_v63 = vpop.xlane.xlu1 %1925 }
 0x984   : > { %v1927_v0 = vsub.f32 %v1918_v44, %v1926_v63 }
 0x986   : > { %v1928_v1 = vmul.f32 1.442695, %v1927_v0 }
 0x988   : > { %3152 = vpow2.f32 %v1928_v1 }
 0x98b   : > { %v2041_v3 = vpop.xlane.xlu0 %2040 }
 0x98c   : > { %v2042_v5 = vsub.f32 %v2033_v49, %v2041_v3 }
 0x98e   : > { %v2043_v6 = vmul.f32 1.442695, %v2042_v5 }
 0x990   : > { %3154 = vpow2.f32 %v2043_v6 }
 0x993   : > { %v2156_v7 = vpop.xlane.xlu0 %2155 }
 0x994   : > { %v2157_v8 = vsub.f32 %v2148_v54, %v2156_v7 }
 0x995   : > { %v3153_v9 = vpop.eup %3152 }
 0x996   : > { %v2158_v11 = vmul.f32 1.442695, %v2157_v8  ;;  %v1930_v12 = vsel %vm1073_vm3, %v3153_v9, 0.0 }
 0x997   : > { %1931 = vadd.xlane.f32.xlu0 %v1930_v12 }
 0x998   : > { %3156 = vpow2.f32 %v2158_v11 }
 0x99d   : > { %v3155_v13 = vpop.eup %3154 }
 0x99e   : > { %v2045_v14 = vsel %vm1073_vm3, %v3155_v13, 0.0 }
 0x99f   : > { %2046 = vadd.xlane.f32.xlu1 %v2045_v14 }
 0x9a5   : > { %v3157_v15 = vpop.eup %3156 }
 0x9a6   : > { %v2160_v16 = vsel %vm1073_vm3, %v3157_v15, 0.0 }
 0x9a7   : > { %2161 = vadd.xlane.f32.xlu0 %v2160_v16  ;;  %v3127_v16 = vld [vmem:[%s3426_s6] sm:$0xff]  }
 0x9ad   : > { %v1819_v17 = vpop.xlane.xlu1 %1818 }
 0x9ae   : > { %3158 = vrcp.f32 %v1819_v17 }
 0x9b0   : > { %2051 = vrot.lane.b32.xlu1 %v3620_v19, %s3214_s2  ;;  %s3873_s2 = sld [smem:[#allocation4_spill]] }
 0x9b1   : > { %v1825_v18 = vpop.permute.xlu1 %1824 }
 0x9b2   : > { %v1830_v20 = vsel %vm1137_vm4, %v1825_v18, 0 }
 0x9b3   : > { %2991 = vmatpush3.bf16.msra.mxu1 %v1830_v20 }
 0x9b4   : > { %2166 = vrot.lane.b32.xlu1 %v3620_v19, %s3216_s23  ;;  %3002 = vmatprep.subr.bf16.mxu1 %v3210_v2  ;;  %s3865_s23 = sld [smem:[#allocation13_spill]] }
 0x9b6   : > { %p2839_p8 = scmp.ne.s32.totalorder %s3873_s2, 1 }
 0x9ba   : > { %v3129_v17 = vld [vmem:[%s3865_s23 + $0x10] sm:$0xff]  }
 0x9bb   : > { %v3159_v21 = vpop.eup %3158 }
 0x9bc   : > { %v1821_v22 = vmul.f32 %v3159_v21, %v3151_v62 }
 0x9bd   : > { %1936 = vrot.lane.b32.xlu0 %v3620_v19, %s3215_s25  ;;  %s3864_s25 = scalar_lea.vmem %s3787_s10, %s3370_s0 }
 0x9be   : > { %v1822_v23 = vpack.c.bf16 %v1821_v22, %v1821_v22  ;;  %v2821_v63 = vld [vmem:[%s3864_s25] ss:$0 sm:$0xff] }
 0x9c0   : > { %2993 = vmatmul.mubr.msk.bf16.vlgmr.msra.gmra.mxu1 %vm1073_vm3, %v1822_v23  ;;  %v2825_v23 = vld [vmem:[%s972_s7] ss:$0 sm:$0xff] }
 0x9c1   : > { %3004 = vmatprep.mubr.msk.bf16.mxu1 %vm3211_vm1, %v3210_v2 }
 0xa20   : > { %v1932_v24 = vpop.xlane.xlu0 %1931 }
 0xa21   : > { %3160 = vrcp.f32 %v1932_v24 }
 0xa28   : > { %v2047_v25 = vpop.xlane.xlu1 %2046 }
 0xa29   : > { %3162 = vrcp.f32 %v2047_v25  ;;  %v2826_v25 = vld [vmem:[%s975_s18] ss:$0 sm:$0xff] }
 0xa2c   : > { %v2052_v31 = vpop.permute.xlu1 %2051 }
 0xa2d   : > { %v2057_v33 = vsel %vm1137_vm4, %v2052_v31, 0  ;;  %v2827_v31 = vld [vmem:[%s3868_s27] ss:$0 sm:$0xff] }
 0xa2e   : > { %v3161_v26 = vpop.eup %3160 }
 0xa2f   : > { %v1934_v28 = vmul.f32 %v3161_v26, %v3153_v9 }
 0xa30   : > { %v2162_v27 = vpop.xlane.xlu0 %2161  ;;  %v2167_v35 = vpop.permute.xlu1 %2166 }
 0xa31   : > { %3164 = vrcp.f32 %v2162_v27  ;;  %v1935_v19 = vpack.c.bf16 %v1934_v28, %v1934_v28  ;;  %v2172_v38 = vsel %vm1137_vm4, %v2167_v35, 0 }
 0xa34   : > { %v1937_v29 = vpop.permute.xlu0 %1936 }
 0xa35   : > { %v1942_v30 = vsel %vm1137_vm4, %v1937_v29, 0  ;;  %v3130_v29 = vld [vmem:[%s3865_s23 + $0x8] sm:$0xff]  }
 0xa36   : > { %3003 = vmatpush3.bf16.msra.mxu1 %v1942_v30  ;;  %v3163_v32 = vpop.eup %3162  ;;  %v3131_v30 = vld [vmem:[%s3865_s23] sm:$0xff]  }
 0xa37   : > { %3014 = vmatprep.subr.bf16.mxu1 %v3210_v2  ;;  %v2049_v34 = vmul.f32 %v3163_v32, %v3155_v13 }
 0xa39   : > { %3005 = vmatmul.mubr.msk.bf16.vlgmr.msra.gmra.mxu1 %vm1073_vm3, %v1935_v19  ;;  %v2050_v36 = vpack.c.bf16 %v2049_v34, %v2049_v34 }
 0xa3a   : > { %3015 = vmatpush3.bf16.msra.mxu1 %v2057_v33  ;;  %3016 = vmatprep.mubr.msk.bf16.mxu1 %vm3211_vm1, %v3210_v2 }
 0xa3b   : > { %3026 = vmatprep.subr.bf16.mxu1 %v3210_v2 }
 0xa3e   : > { %v3165_v37 = vpop.eup %3164 }
 0xa3f   : > { %v2164_v39 = vmul.f32 %v3165_v37, %v3157_v15  ;;  %v3126_v15 = vld [vmem:[%s3426_s6 + $0x8] sm:$0xff]  }
 0xa41   : > { %3017 = vmatmul.mubr.msk.bf16.vlgmr.msra.gmra.mxu1 %vm1073_vm3, %v2050_v36  ;;  %v2165_v40 = vpack.c.bf16 %v2164_v39, %v2164_v39 }
 0xa42   : > { %3027 = vmatpush3.bf16.msra.mxu1 %v2172_v38  ;;  %3028 = vmatprep.mubr.msk.bf16.mxu1 %vm3211_vm1, %v3210_v2 }
 0xa43   : > { %3040 = vmatprep.subr.bf16.mxu1 %v3210_v2 }
 0xa49   : > { %3029 = vmatmul.mubr.msk.bf16.vlgmr.msra.gmra.mxu1 %vm1073_vm3, %v2165_v40 }
 0xa4a   : > { %3044 = vmatprep.mubr.msk.bf16.mxu1 %vm3211_vm1, %v3210_v2  ;;  %3041 = vmatpush3.bf16.msra.mxu1 %v3126_v15 }
 0xa4b   : > { %3042 = vmatprep.subr.bf16.mxu1 %v3210_v2 }
 0xa4e   : > { %3043 = vmatpush3.bf16.msra.mxu1 %v3127_v16 }
 0xa80   : > { %v1866_v41 = vpop.f32.mrf.mxu1 }
 0xa81   : > { %1872 = vst.msk [vmem:[#allocation3] sm:$0xff] %vm1073_vm3, %v1866_v41 }
 0xa82   : > { %v2994_v42 = vpop.f32.mrf.mxu1 }
 0xa84   : > { %v1869_v43 = vpop.f32.mrf.mxu1 }
 0xa86   : > { %v2995_v44 = vpop.f32.mrf.mxu1 }
 0xaf9   : > { %v1978_v45 = vpop.f32.mrf.mxu1 }
 0xafa   : > { %1985 = vrot.lane.b32.xlu0 %v1978_v45, %s3223_s11 }
 0xafb   : > { %v3006_v46 = vpop.f32.mrf.mxu1 }
 0xafd   : > { %v1981_v47 = vpop.f32.mrf.mxu1 }
 0xaff   : > { %v3007_v49 = vpop.f32.mrf.mxu1 }
 0xb01   : > { %v2093_v51 = vpop.f32.mrf.mxu1 }
 0xb02   : > { %2100 = vrot.lane.b32.xlu1 %v2093_v51, %s3224_s12 }
 0xb03   : > { %v3018_v52 = vpop.f32.mrf.mxu1 }
 0xb05   : > { %v2096_v53 = vpop.f32.mrf.mxu1 }
 0xb07   : > { %v3019_v54 = vpop.f32.mrf.mxu1 }
 0xb08   : > { %v2837_v54 = vld [vmem:[%s978_s22] ss:$0 sm:$0xff] }
 0xb09   : > { %v2208_v55 = vpop.f32.mrf.mxu1 }
 0xb0a   : > { %2215 = vrot.lane.b32.xlu0 %v2208_v55, %s3225_s13 }
 0xb0b   : > { %v3030_v56 = vpop.f32.mrf.mxu1 }
 0xb0c   : > { %v2838_v56 = vld [vmem:[%s981_s28] ss:$0 sm:$0xff] }
 0xb0d   : > { %v2211_v57 = vpop.f32.mrf.mxu1 }
 0xb0f   : > { %v3031_v58 = vpop.f32.mrf.mxu1 }
 0xb6c   : > { %v1986_v59 = vpop.permute.xlu0 %1985 }
 0xb6d   : > { %1988 = vst.msk [vmem:[#allocation3] sm:$0xff] %vm1296_vm5, %v1986_v59 }
 0xb74   : > { %v2101_v60 = vpop.permute.xlu1 %2100 }
 0xb75   : > { %2103 = vst.msk [vmem:[#allocation3] sm:$0xff] %vm1412_vm6, %v2101_v60 }
 0xb7c   : > { %v2216_v61 = vpop.permute.xlu0 %2215 }
 0xb7d   : > { %2218 = vst.msk [vmem:[#allocation3] sm:$0xff] %vm1528_vm7, %v2216_v61 }
 0xb84   : > { %v2219_v62 = vld [vmem:[#allocation3] sm:$0xff] }
 0xb85   : > { %v2220_v4 = vpack.c.bf16 %v2219_v62, %v2219_v62 }
 0xb87   : > { %3037 = vmatmul.mubr.msk.bf16.vlgmr.msra.gmra.mxu0 %vm1020_vm2, %v2220_v4 }
 0xb88   : > { %3056 = vmatprep.mubr.msk.bf16.mxu0 %vm3211_vm1, %v3210_v2 }
 0xc47   : > { %v2276_v0 = vpop.f32.mrf.mxu0 }
 0xc48   : > { %v2277_v1 = vadd.f32 %v2821_v63, %v2276_v0 }
 0xc49   : > { %v3038_v3 = vpop.f32.mrf.mxu0 }
 0xc4a   : > { %v2282_v5 = vadd.f32 %v2277_v1, %v3608_v10  ;;  %v3128_v10 = vld [vmem:[%s3865_s23 + $0x18] sm:$0xff]  }
 0xc4b   : > { %v2279_v6 = vpop.f32.mrf.mxu0  ;;  %3049 = vmatpush3.bf16.msra.mxu0 %v3128_v10 }
 0xc4c   : > { %v2285_v7 = vsel %vm1020_vm2, %v2282_v5, 0.0  ;;  %3050 = vmatprep.subr.bf16.mxu0 %v3210_v2 }
 0xc4d   : > { %2286 = vadd.xlane.f32.xlu1 %v2285_v7  ;;  %v3039_v8 = vpop.f32.mrf.mxu0 }
 0xc4f   : > { %3051 = vmatpush3.bf16.msra.mxu0 %v3129_v17 }
 0xc50   : > { %3052 = vmatprep.subr.bf16.mxu0 %v3210_v2 }
 0xc53   : > { %3053 = vmatpush3.bf16.msra.mxu0 %v3130_v29 }
 0xc54   : > { %3054 = vmatprep.subr.bf16.mxu0 %v3210_v2  ;;  %v2831_v2 = vld [vmem:[%s3870_s24] ss:$0 sm:$0xff] }
 0xc57   : > { %3055 = vmatpush3.bf16.msra.mxu0 %v3131_v30 }
 0xcd6   : > { %v2287_v9 = vpop.xlane.xlu1 %2286 }
 0xcd7   : > { %v2288_v11 = vmul.f32 0.03125, %v2287_v9 }
 0xcd9   : > { %v2289_v12 = vsub.f32 %v2282_v5, %v2288_v11 }
 0xcdb   : > { %v2290_v13 = vmul.f32 %v2289_v12, %v2289_v12 }
 0xcdd   : > { %v2291_v14 = vsel %vm1020_vm2, %v2290_v13, 0.0 }
 0xcde   : > { %2292 = vadd.xlane.f32.xlu0 %v2291_v14 }
 0xd67   : > { %v2293_v18 = vpop.xlane.xlu0 %2292 }
 0xd68   : > { %v2294_v20 = vmul.f32 0.03125, %v2293_v18 }
 0xd6a   : > { %v2295_v21 = vadd.f32 1e-05, %v2294_v20 }
 0xd6c   : > { %3166 = vrsqrt.f32 %v2295_v21 }
 0xd79   : > { %v3167_v22 = vpop.eup %3166 }
 0xd7a   : > { %v2297_v24 = vmul.f32 %v3167_v22, %v2289_v12 }
 0xd7c   : > { %v2304_v26 = vmul.f32 %v2825_v23, %v2297_v24 }
 0xd7e   : > { %v2311_v27 = vadd.f32 %v2826_v25, %v2304_v26 }
 0xd80   : > { %v2312_v28 = vpack.c.bf16 %v2311_v27, %v2311_v27 }
 0xd82   : > { %3045 = vmatmul.mubr.msk.bf16.vlgmr.msra.gmra.mxu1 %vm1020_vm2, %v2312_v28 }
 0xe42   : > { %v2373_v19 = vpop.f32.mrf.mxu1 }
 0xe43   : > { %v2374_v32 = vadd.f32 %v2827_v31, %v2373_v19 }
 0xe44   : > { %v3046_v33 = vpop.f32.mrf.mxu1 }
 0xe45   : > { %v2379_v34 = vmax.f32 %v2374_v32, 0.0 }
 0xe46   : > { %v2376_v35 = vpop.f32.mrf.mxu1 }
 0xe47   : > { %v2380_v36 = vpack.c.bf16 %v2379_v34, %v2379_v34 }
 0xe48   : > { %v3047_v37 = vpop.f32.mrf.mxu1 }
 0xe49   : > { %3057 = vmatmul.mubr.msk.bf16.vlgmr.msra.gmra.mxu0 %vm2420_vm8, %v2380_v36 }
 0xf09   : > { %v2458_v38 = vpop.f32.mrf.mxu0 }
 0xf0a   : > { %v2459_v39 = vadd.f32 %v2831_v2, %v2458_v38 }
 0xf0b   : > { %v3058_v40 = vpop.f32.mrf.mxu0 }
 0xf0c   : > { %v2464_v41 = vadd.f32 %v2459_v39, %v2311_v27 }
 0xf0d   : > { %v2461_v42 = vpop.f32.mrf.mxu0 }
 0xf0e   : > { %v2467_v43 = vsel %vm1020_vm2, %v2464_v41, 0.0 }
 0xf0f   : > { %2468 = vadd.xlane.f32.xlu0 %v2467_v43  ;;  %v3059_v44 = vpop.f32.mrf.mxu0 }
 0xf98   : > { %v2469_v45 = vpop.xlane.xlu0 %2468 }
 0xf99   : > { %v2470_v46 = vmul.f32 0.03125, %v2469_v45 }
 0xf9b   : > { %v2471_v47 = vsub.f32 %v2464_v41, %v2470_v46 }
 0xf9d   : > { %v2472_v48 = vmul.f32 %v2471_v47, %v2471_v47 }
 0xf9f   : > { %v2473_v49 = vsel %vm1020_vm2, %v2472_v48, 0.0 }
 0xfa0   : > { %2474 = vadd.xlane.f32.xlu1 %v2473_v49 }
0x1029   : > { %v2475_v50 = vpop.xlane.xlu1 %2474 }
0x102a   : > { %v2476_v51 = vmul.f32 0.03125, %v2475_v50 }
0x102c   : > { %v2477_v52 = vadd.f32 1e-05, %v2476_v51 }
0x102e   : > { %3168 = vrsqrt.f32 %v2477_v52 }
0x103b   : > { %v3169_v53 = vpop.eup %3168 }
0x103c   : > { %v2479_v55 = vmul.f32 %v3169_v53, %v2471_v47 }
0x103e   : > { %v2486_v57 = vmul.f32 %v2837_v54, %v2479_v55  ;;  %2498 = sbr.rel (%p2839_p8) target bundleno = 4164 (0x1044), region = 112 }
0x1040   : > { %v2493_v58 = vadd.f32 %v2838_v56, %v2486_v57 }
0x1042   : > { %2494 = vst.msk [vmem:[#allocation2] sm:$0xff] %vm1020_vm2, %v2493_v58 }
0x1043   : > { %2499 = vst.msk [vmem:[%s3469_s3] sm:$0xff] %vm1020_vm2, %v2493_v58 }
0x1044 PF: > { %s3874_s25 = sld [smem:[#allocation7_spill]] }
0x1045   : > { %s3875_s2 = sld [smem:[#allocation5_spill]] }
0x1046   : > { %s3877_s26 = sld [smem:[#allocation8_spill]] }
0x1047   : > { %s3878_s27 = sld [smem:[#allocation9_spill]] }
0x104a   : > { %s31_s3 = sadd.s32 1, %s3874_s25   ;;  %s3876_s25 = sld [smem:[#allocation6_spill]] }
0x104b   : > { %p28_p9 = scmp.ge.s32.totalorder %s31_s3, 6  }
0x104d   :  { %30 = sbr.rel (!%p28_p9) target bundleno = 18 (0x12), region = 202 }

</bundles_post_ra>
